<compile_context>
chip_gen: v6e
topology: v6e:2x2x1
jax: 0.10.0
libtpu: 0.0.40
codegen_flags: <defaults>
</compile_context>

<pallas_src>
import functools
import math

import jax
import jax.numpy as jnp
from jax.experimental import pallas as pl
from jax.experimental.pallas import tpu as pltpu


_DEFAULT_TILE_M = 512            # rows per grid step for M-tiled kernels
_DEFAULT_TILE_S = 256            # sequence tile for the per-batch kernels
_VMEM_LIMIT = 48 * 1024 * 1024   # explicit scoped-VMEM budget (safe on v5e/v6e/v7x)


def _tile(n, target):
    # Full extent when it fits in one tile, otherwise an 8-aligned tile.
    return n if n <= target else target


# --------------------- Buffered(1) support probe ------------------------------

def _probe_copy_kernel(x_ref, o_ref):
    o_ref[...] = x_ref[...]


@functools.lru_cache(maxsize=None)
def _single_buffer_supported():
    """True iff this JAX build accepts pipeline_mode=pl.Buffered(1) on TPU."""
    try:
        fn = pl.pallas_call(
            _probe_copy_kernel,
            out_shape=jax.ShapeDtypeStruct((16, 128), jnp.float32),
            grid=(2,),
            in_specs=[pl.BlockSpec((8, 128), lambda i: (0, 0),
                                   pipeline_mode=pl.Buffered(1))],
            out_specs=pl.BlockSpec((8, 128), lambda i: (i, 0)),
        )
        jax.block_until_ready(fn(jnp.zeros((8, 128), jnp.float32)))
        return True
    except Exception:
        return False


def _weight_spec(block_shape, index_map):
    """BlockSpec for a grid-invariant weight: single-buffered when supported."""
    if _single_buffer_supported():
        return pl.BlockSpec(block_shape, index_map,
                            pipeline_mode=pl.Buffered(1))
    return pl.BlockSpec(block_shape, index_map)


# --------------------------- patch embedding linear --------------------------

def _linear_kernel(x_ref, w_ref, b_ref, o_ref):
    o_ref[...] = (jnp.dot(x_ref[...].astype(jnp.bfloat16), w_ref[...],
                          preferred_element_type=jnp.float32) + b_ref[...])


def linear_pallas(x, w, b, *, tile_m=_DEFAULT_TILE_M):
    """y = x @ w + b (bf16 MXU, f32 accum).  x: (M, K) f32, w: (K, N) bf16."""
    M, K = x.shape
    N = w.shape[1]
    tm = _tile(M, tile_m)
    return pl.pallas_call(
        _linear_kernel,
        out_shape=jax.ShapeDtypeStruct((M, N), jnp.float32),
        grid=(pl.cdiv(M, tm),),
        in_specs=[pl.BlockSpec((tm, K), lambda i: (i, 0)),
                  _weight_spec((K, N), lambda i: (0, 0)),
                  pl.BlockSpec((1, N), lambda i: (0, 0))],
        out_specs=pl.BlockSpec((tm, N), lambda i: (i, 0)),
        compiler_params=pltpu.CompilerParams(
            dimension_semantics=("parallel",),
            vmem_limit_bytes=_VMEM_LIMIT),
    )(x, w, b.reshape(1, N))


# ----------- fused positional-encoding add + QKV (head-major out) ------------

def _pe_qkv_kernel(x_ref, pe_ref, w_ref, b_ref, q_ref, k_ref, v_ref,
                   *, n_heads, emb_dim):
    h = x_ref[0] + pe_ref[...]                                    # (tS, E) f32
    qkv = (jnp.dot(h.astype(jnp.bfloat16), w_ref[...],
                   preferred_element_type=jnp.float32) + b_ref[...])  # (tS, 3E)
    E = emb_dim
    Dh = E // n_heads
    # Split/transpose to head-major happens once here (not in attention).
    for hh in range(n_heads):
        q_ref[0, hh] = qkv[:, hh * Dh:(hh + 1) * Dh].astype(jnp.bfloat16)
        k_ref[0, hh] = qkv[:, E + hh * Dh:E + (hh + 1) * Dh].astype(jnp.bfloat16)
        v_ref[0, hh] = qkv[:, 2 * E + hh * Dh:2 * E + (hh + 1) * Dh].astype(
            jnp.bfloat16)


def pe_qkv_pallas(x, pe, wqkv, bqkv, *, n_heads, tile_s=_DEFAULT_TILE_S):
    """q,k,v (B,H,S,Dh) bf16 from h = x + pe; qkv = h @ Wqkv + bqkv."""
    B, S, E = x.shape
    N = wqkv.shape[1]
    Dh = E // n_heads
    ts = _tile(S, tile_s)
    qkv_shape = jax.ShapeDtypeStruct((B, n_heads, S, Dh), jnp.bfloat16)
    return pl.pallas_call(
        functools.partial(_pe_qkv_kernel, n_heads=n_heads, emb_dim=E),
        out_shape=(qkv_shape, qkv_shape, qkv_shape),
        grid=(B, pl.cdiv(S, ts)),
        in_specs=[pl.BlockSpec((1, ts, E), lambda b, s: (b, s, 0)),
                  pl.BlockSpec((ts, E), lambda b, s: (s, 0)),
                  _weight_spec((E, N), lambda b, s: (0, 0)),
                  pl.BlockSpec((1, N), lambda b, s: (0, 0))],
        out_specs=tuple(
            pl.BlockSpec((1, n_heads, ts, Dh), lambda b, s: (b, 0, s, 0))
            for _ in range(3)),
        compiler_params=pltpu.CompilerParams(
            dimension_semantics=("parallel", "parallel"),
            vmem_limit_bytes=_VMEM_LIMIT),
    )(x, pe, wqkv, bqkv.reshape(1, N))


# ---------------------- attention (grid over batch x head) -------------------

def _attn_kernel(q_ref, k_ref, v_ref, ctx_ref, attn_ref, *, scale):
    q = q_ref[0, 0]                                               # (S, Dh) bf16
    k = k_ref[0, 0]
    v = v_ref[0, 0]
    # QK^T via dot_general contracting the last dims: no explicit transpose.
    s = jax.lax.dot_general(q, k, (((1,), (1,)), ((), ())),
                            preferred_element_type=jnp.float32) * scale
    m = jnp.max(s, axis=-1, keepdims=True)
    p = jnp.exp(s - m)
    # Exact divide: these probabilities are returned to the caller.
    p = p / jnp.sum(p, axis=-1, keepdims=True)
    attn_ref[0, 0] = p
    ctx_ref[0, 0] = jnp.dot(p.astype(jnp.bfloat16), v,
                            preferred_element_type=jnp.float32
                            ).astype(ctx_ref.dtype)


def attention_pallas(q, k, v):
    """q/k/v: (B, H, S, Dh) bf16 -> ctx (B, H, S, Dh) bf16, attn (B, H, S, S) f32."""
    B, H, S, Dh = q.shape
    scale = 1.0 / math.sqrt(Dh)
    ctx, attn = pl.pallas_call(
        functools.partial(_attn_kernel, scale=scale),
        out_shape=(jax.ShapeDtypeStruct((B, H, S, Dh), jnp.bfloat16),
                   jax.ShapeDtypeStruct((B, H, S, S), jnp.float32)),
        grid=(B, H),
        in_specs=[pl.BlockSpec((1, 1, S, Dh), lambda b, h: (b, h, 0, 0)),
                  pl.BlockSpec((1, 1, S, Dh), lambda b, h: (b, h, 0, 0)),
                  pl.BlockSpec((1, 1, S, Dh), lambda b, h: (b, h, 0, 0))],
        out_specs=(pl.BlockSpec((1, 1, S, Dh), lambda b, h: (b, h, 0, 0)),
                   pl.BlockSpec((1, 1, S, S), lambda b, h: (b, h, 0, 0))),
        compiler_params=pltpu.CompilerParams(
            dimension_semantics=("parallel", "parallel"),
            vmem_limit_bytes=_VMEM_LIMIT),
    )(q, k, v)
    return ctx, attn


# ---- fused out-projection (head-major merge) + residual(x+pe) + LayerNorm ---

def _proj_res_ln_kernel(ctx_ref, x_ref, pe_ref, wo_ref, bo_ref, g_ref, beta_ref,
                        o_ref, *, n_heads, eps):
    # Recompute the residual h = x + pe in-kernel (h never touches HBM).
    y = x_ref[0] + pe_ref[...] + bo_ref[...]                      # (tS, E) f32
    # Head merge == per-head matmul accumulation against wo[h*Dh:(h+1)*Dh, :].
    for hh in range(n_heads):
        y = y + jnp.dot(ctx_ref[0, hh], wo_ref[hh],
                        preferred_element_type=jnp.float32)
    mu = jnp.mean(y, axis=-1, keepdims=True)
    var = jnp.mean((y - mu) ** 2, axis=-1, keepdims=True)
    o_ref[0] = (y - mu) * jax.lax.rsqrt(var + eps) * g_ref[...] + beta_ref[...]


def proj_residual_layernorm_pallas(ctx, x, pe, wo_hm, bo, gamma, beta,
                                   eps=1e-5, tile_s=_DEFAULT_TILE_S):
    """LayerNorm((x + pe) + merge_heads(ctx) @ Wo + bo)."""
    B, H, S, Dh = ctx.shape
    E = x.shape[-1]
    ts = _tile(S, tile_s)
    return pl.pallas_call(
        functools.partial(_proj_res_ln_kernel, n_heads=H, eps=eps),
        out_shape=jax.ShapeDtypeStruct((B, S, E), jnp.float32),
        grid=(B, pl.cdiv(S, ts)),
        in_specs=[pl.BlockSpec((1, H, ts, Dh), lambda b, s: (b, 0, s, 0)),
                  pl.BlockSpec((1, ts, E), lambda b, s: (b, s, 0)),
                  pl.BlockSpec((ts, E), lambda b, s: (s, 0)),
                  _weight_spec((H, Dh, E), lambda b, s: (0, 0, 0)),
                  pl.BlockSpec((1, E), lambda b, s: (0, 0)),
                  pl.BlockSpec((1, E), lambda b, s: (0, 0)),
                  pl.BlockSpec((1, E), lambda b, s: (0, 0))],
        out_specs=pl.BlockSpec((1, ts, E), lambda b, s: (b, s, 0)),
        compiler_params=pltpu.CompilerParams(
            dimension_semantics=("parallel", "parallel"),
            vmem_limit_bytes=_VMEM_LIMIT),
    )(ctx, x, pe, wo_hm, bo.reshape(1, E), gamma.reshape(1, E),
      beta.reshape(1, E))


# ---------------------- fused FFN + residual + LayerNorm --------------------

def _ffn_res_ln_kernel(x_ref, w1_ref, b1_ref, w2_ref, b2_ref, g_ref, beta_ref,
                       o_ref, *, eps):
    x = x_ref[...]                                                # (tm, E) f32
    t = jnp.maximum(
        jnp.dot(x.astype(jnp.bfloat16), w1_ref[...],
                preferred_element_type=jnp.float32) + b1_ref[...], 0.0)
    y = (x + jnp.dot(t.astype(jnp.bfloat16), w2_ref[...],
                     preferred_element_type=jnp.float32) + b2_ref[...])
    mu = jnp.mean(y, axis=-1, keepdims=True)
    var = jnp.mean((y - mu) ** 2, axis=-1, keepdims=True)
    o_ref[...] = (y - mu) * jax.lax.rsqrt(var + eps) * g_ref[...] + beta_ref[...]


def ffn_residual_layernorm_pallas(x2d, w1, b1, w2, b2, gamma, beta,
                                  eps=1e-5, tile_m=_DEFAULT_TILE_M):
    """LayerNorm(x + relu(x @ w1 + b1) @ w2 + b2).  x2d: (M, E) f32."""
    M, E = x2d.shape
    H = w1.shape[1]
    tm = _tile(M, tile_m)
    return pl.pallas_call(
        functools.partial(_ffn_res_ln_kernel, eps=eps),
        out_shape=jax.ShapeDtypeStruct((M, E), jnp.float32),
        grid=(pl.cdiv(M, tm),),
        in_specs=[pl.BlockSpec((tm, E), lambda i: (i, 0)),
                  _weight_spec((E, H), lambda i: (0, 0)),
                  pl.BlockSpec((1, H), lambda i: (0, 0)),
                  _weight_spec((H, E), lambda i: (0, 0)),
                  pl.BlockSpec((1, E), lambda i: (0, 0)),
                  pl.BlockSpec((1, E), lambda i: (0, 0)),
                  pl.BlockSpec((1, E), lambda i: (0, 0))],
        out_specs=pl.BlockSpec((tm, E), lambda i: (i, 0)),
        compiler_params=pltpu.CompilerParams(
            dimension_semantics=("parallel",),
            vmem_limit_bytes=_VMEM_LIMIT),
    )(x2d, w1, b1.reshape(1, H), w2, b2.reshape(1, E),
      gamma.reshape(1, E), beta.reshape(1, E))


# ------------------------------- plain-JAX glue ------------------------------

def patchify(image, patch_size):
    # layout: NCHW -> (B, num_patches, p*p*C), inner flatten order (p1, p2, C)
    # TODO(synk): PyTorch unfold/Conv2d patch embedding flattens as (C, p1, p2);
    # loading pretrained PyTorch weights would need a column permutation.
    B, C, H, W = image.shape
    p = patch_size
    hp, wp = H // p, W // p
    x = image.reshape(B, C, hp, p, wp, p)
    x = x.transpose(0, 2, 4, 3, 5, 1)                 # (B, hp, wp, p1, p2, C)
    return x.reshape(B, hp * wp, p * p * C)


def sinusoidal_pe(seq_len, dim):
    pos = jnp.arange(seq_len, dtype=jnp.float32)[:, None]
    div = jnp.exp(jnp.arange(0, dim, 2, dtype=jnp.float32)
                  * (-math.log(10000.0) / dim))
    pe = jnp.zeros((seq_len, dim), jnp.float32)
    pe = pe.at[:, 0::2].set(jnp.sin(pos * div))
    pe = pe.at[:, 1::2].set(jnp.cos(pos * div))
    return pe


def init_params(key, *, patch_dim, emb_dim, hid_dim, n_layers, n_heads,
                output_dim):
    def dense(k, fan_in, fan_out):
        k1, k2 = jax.random.split(k)
        lim = 1.0 / math.sqrt(fan_in)
        w = jax.random.uniform(k1, (fan_in, fan_out), jnp.float32, -lim, lim)
        b = jax.random.uniform(k2, (fan_out,), jnp.float32, -lim, lim)
        return w, b

    Dh = emb_dim // n_heads
    keys = jax.random.split(key, 3 + n_layers)
    params = {
        # class_embedding ~ Normal(0, 0.02) as in _init_weights
        'cls': 0.02 * jax.random.normal(keys[0], (1, 1, emb_dim), jnp.float32),
    }
    pw, pb = dense(keys[1], patch_dim, emb_dim)
    params['patch_w'] = pw.astype(jnp.bfloat16)       # bf16 MXU operand
    params['patch_b'] = pb
    params['out_w'], params['out_b'] = dense(keys[2], emb_dim, output_dim)

    layers = []
    for l in range(n_layers):
        lk = jax.random.split(keys[3 + l], 6)
        layer = {}
        wq, bq = dense(lk[0], emb_dim, emb_dim)
        wk, bk = dense(lk[1], emb_dim, emb_dim)
        wv, bv = dense(lk[2], emb_dim, emb_dim)
        # fuse Q/K/V projections into one (E, 3E) bf16 matmul
        layer['wqkv'] = jnp.concatenate([wq, wk, wv], axis=1).astype(jnp.bfloat16)
        layer['bqkv'] = jnp.concatenate([bq, bk, bv], axis=0)
        wo, bo = dense(lk[3], emb_dim, emb_dim)
        # head-major out-projection weight: (H, Dh, E) so the proj kernel can
        # merge heads via per-head matmul accumulation (no transpose/concat)
        layer['wo_hm'] = wo.reshape(n_heads, Dh, emb_dim).astype(jnp.bfloat16)
        layer['bo'] = bo
        w1, b1 = dense(lk[4], emb_dim, hid_dim)
        w2, b2 = dense(lk[5], hid_dim, emb_dim)
        layer['w1'] = w1.astype(jnp.bfloat16)
        layer['b1'] = b1
        layer['w2'] = w2.astype(jnp.bfloat16)
        layer['b2'] = b2
        layer['ln1_g'] = jnp.ones((emb_dim,), jnp.float32)
        layer['ln1_b'] = jnp.zeros((emb_dim,), jnp.float32)
        layer['ln2_g'] = jnp.ones((emb_dim,), jnp.float32)
        layer['ln2_b'] = jnp.zeros((emb_dim,), jnp.float32)
        layers.append(layer)
    params['layers'] = layers
    return params


def vit_forward(params, image, *, patch_size, n_heads):
    """Returns (logits, [attention scores per layer])."""
    if image.ndim != 4:
        raise ValueError(f'Image batch must have 4 dimensions: {image.shape}')
    B = image.shape[0]

    patches = patchify(image, patch_size)                       # (B, nP, pdim)
    nP, pdim = patches.shape[1], patches.shape[2]
    emb = linear_pallas(patches.reshape(B * nP, pdim),
                        params['patch_w'], params['patch_b'])
    emb = emb.reshape(B, nP, -1)

    cls = jnp.broadcast_to(params['cls'], (B, 1, emb.shape[-1]))
    x = jnp.concatenate([cls, emb], axis=1)                     # (B, S, E) f32
    S, E = x.shape[1], x.shape[2]
    pe = sinusoidal_pe(S, E)

    attn_per_layer = []
    for layer in params['layers']:
        # TODO(synk): the reference's PositionalEncoding is constructed inside
        # each encoder layer; we assume PE is added at the start of every layer,
        # post-LN ordering, and dropout is identity at inference time.
        q, k, v = pe_qkv_pallas(x, pe, layer['wqkv'], layer['bqkv'],
                                n_heads=n_heads)                # (B,H,S,Dh) bf16
        ctx, attn = attention_pallas(q, k, v)                   # bf16 / f32

        y1 = proj_residual_layernorm_pallas(
            ctx, x, pe, layer['wo_hm'], layer['bo'],
            layer['ln1_g'], layer['ln1_b'])                     # (B, S, E) f32
        y2 = ffn_residual_layernorm_pallas(
            y1.reshape(B * S, E), layer['w1'], layer['b1'],
            layer['w2'], layer['b2'], layer['ln2_g'], layer['ln2_b'])

        x = y2.reshape(B, S, E)
        attn_per_layer.append(attn)

    cls_out = x[:, 0, :]
    # Tiny (B, E) @ (E, n_classes) classifier stays in XLA (a pallas_call here
    # is pure launch overhead with a maximally masked store).
    logits = cls_out @ params['out_w'] + params['out_b']
    return logits, attn_per_layer


# ---------------------------------- driver ----------------------------------

if __name__ == "__main__":
    # Small, forward-consistent configuration.
    image_width = image_height = 16
    image_channels = 4
    patch_size = 8
    emb_dim = 32
    n_heads = 4
    hid_dim = 64
    n_layers = 2
    output_dim = 10
    batch = 2

    num_patches = (image_width // patch_size) * (image_height // patch_size)
    patch_dim = patch_size * patch_size * image_channels

    key = jax.random.PRNGKey(0)
    k_img, k_par = jax.random.split(key)
    image = jax.random.normal(
        k_img, (batch, image_channels, image_height, image_width), jnp.float32)

    params = init_params(k_par, patch_dim=patch_dim, emb_dim=emb_dim,
                         hid_dim=hid_dim, n_layers=n_layers, n_heads=n_heads,
                         output_dim=output_dim)

    fwd = jax.jit(functools.partial(vit_forward, patch_size=patch_size,
                                    n_heads=n_heads))
    logits, attn_per_layer = fwd(params, image)
    jax.block_until_ready(logits)
    for a in attn_per_layer:
        jax.block_until_ready(a)

    assert logits.shape == (batch, output_dim)
    assert len(attn_per_layer) == n_layers
    assert attn_per_layer[-1].shape == (batch, n_heads,
                                        num_patches + 1, num_patches + 1)
    assert bool(jnp.all(jnp.isfinite(logits)))
    print("KERNEL_OK")
</pallas_src>

<mosaic_0001>
module attributes {stable_mosaic.version = 11 : i64} {
  func.func @_linear_kernel(%arg0: i32, %arg1: memref<8x256xf32, #tpu.memory_space<vmem>>, %arg2: memref<256x32xbf16, #tpu.memory_space<vmem>>, %arg3: memref<1x32xf32, #tpu.memory_space<vmem>>, %arg4: memref<8x32xf32, #tpu.memory_space<vmem>>) attributes {dimension_semantics = [#tpu.dimension_semantics<parallel>], iteration_bounds = array<i64: 1>, scalar_prefetch = 0 : i64, scratch_operands = 0 : i64, tpu.core_type = #tpu.core_type<tc>, window_params = [{transform_indices = @transform_0, window_bounds = array<i64: 8, 256>}, {pipeline_mode = #tpu.pipeline_mode<synchronous>, transform_indices = @transform_1, window_bounds = array<i64: 256, 32>}, {pipeline_mode = #tpu.pipeline_mode<synchronous>, transform_indices = @transform_2, window_bounds = array<i64: 1, 32>}, {transform_indices = @transform_3, window_bounds = array<i64: 8, 32>}]} {
    %c0 = arith.constant 0 : index
    %c0_0 = arith.constant 0 : index
    %0 = vector.load %arg1[%c0, %c0_0] : memref<8x256xf32, #tpu.memory_space<vmem>>, vector<8x256xf32>
    %1 = arith.truncf %0 : vector<8x256xf32> to vector<8x256xbf16>
    %c0_1 = arith.constant 0 : index
    %c0_2 = arith.constant 0 : index
    %2 = vector.load %arg2[%c0_1, %c0_2] : memref<256x32xbf16, #tpu.memory_space<vmem>>, vector<256x32xbf16>
    %cst = arith.constant dense<0.000000e+00> : vector<8x32xf32>
    %3 = tpu.matmul %1, %2, %cst {dimension_numbers = #tpu.dot_dimension_numbers<[1], [0], [0], [1], [0, 0, 1, 1], [], []>} : vector<8x256xbf16>, vector<256x32xbf16>, vector<8x32xf32> -> vector<8x32xf32>
    %c0_3 = arith.constant 0 : index
    %c0_4 = arith.constant 0 : index
    %4 = vector.load %arg3[%c0_3, %c0_4] : memref<1x32xf32, #tpu.memory_space<vmem>>, vector<1x32xf32>
    %5 = vector.broadcast %4 : vector<1x32xf32> to vector<8x32xf32>
    %6 = arith.addf %3, %5 : vector<8x32xf32>
    %c0_5 = arith.constant 0 : index
    %c0_6 = arith.constant 0 : index
    %7 = vector.load %arg4[%c0_5, %c0_6] : memref<8x32xf32, #tpu.memory_space<vmem>>, vector<8x32xf32>
    tpu.vector_store %arg4[%c0_5, %c0_6], %6 {strides = array<i32>} : memref<8x32xf32, #tpu.memory_space<vmem>>, vector<8x32xf32>,
    return
  }
  func.func @transform_0(%arg0: i32) -> (i32, i32) {
    %c0_i32 = arith.constant 0 : i32
    %c0_i32_0 = arith.constant 0 : i32
    return %arg0, %c0_i32 : i32, i32
  }
  func.func @transform_1(%arg0: i32) -> (i32, i32) {
    %c0_i32 = arith.constant 0 : i32
    %c0_i32_0 = arith.constant 0 : i32
    %c0_i32_1 = arith.constant 0 : i32
    return %c0_i32, %c0_i32_0 : i32, i32
  }
  func.func @transform_2(%arg0: i32) -> (i32, i32) {
    %c0_i32 = arith.constant 0 : i32
    %c0_i32_0 = arith.constant 0 : i32
    %c0_i32_1 = arith.constant 0 : i32
    return %c0_i32, %c0_i32_0 : i32, i32
  }
  func.func @transform_3(%arg0: i32) -> (i32, i32) {
    %c0_i32 = arith.constant 0 : i32
    %c0_i32_0 = arith.constant 0 : i32
    return %arg0, %c0_i32 : i32, i32
  }
}

module attributes {stable_mosaic.version = 11 : i64} {
  func.func @_pe_qkv_kernel(%arg0: i32, %arg1: i32, %arg2: memref<1x5x32xf32, #tpu.memory_space<vmem>>, %arg3: memref<5x32xf32, #tpu.memory_space<vmem>>, %arg4: memref<32x96xbf16, #tpu.memory_space<vmem>>, %arg5: memref<1x96xf32, #tpu.memory_space<vmem>>, %arg6: memref<1x4x5x8xbf16, #tpu.memory_space<vmem>>, %arg7: memref<1x4x5x8xbf16, #tpu.memory_space<vmem>>, %arg8: memref<1x4x5x8xbf16, #tpu.memory_space<vmem>>) attributes {dimension_semantics = [#tpu.dimension_semantics<parallel>, #tpu.dimension_semantics<parallel>], iteration_bounds = array<i64: 2, 1>, scalar_prefetch = 0 : i64, scratch_operands = 0 : i64, tpu.core_type = #tpu.core_type<tc>, window_params = [{transform_indices = @transform_0, window_bounds = array<i64: 1, 5, 32>}, {transform_indices = @transform_1, window_bounds = array<i64: 5, 32>}, {pipeline_mode = #tpu.pipeline_mode<synchronous>, transform_indices = @transform_2, window_bounds = array<i64: 32, 96>}, {pipeline_mode = #tpu.pipeline_mode<synchronous>, transform_indices = @transform_3, window_bounds = array<i64: 1, 96>}, {transform_indices = @transform_4, window_bounds = array<i64: 1, 4, 5, 8>}, {transform_indices = @transform_5, window_bounds = array<i64: 1, 4, 5, 8>}, {transform_indices = @transform_6, window_bounds = array<i64: 1, 4, 5, 8>}]} {
    %c0 = arith.constant 0 : index
    %c0_0 = arith.constant 0 : index
    %c0_1 = arith.constant 0 : index
    %0 = vector.load %arg2[%c0, %c0_0, %c0_1] : memref<1x5x32xf32, #tpu.memory_space<vmem>>, vector<1x5x32xf32>
    %1 = vector.shape_cast %0 : vector<1x5x32xf32> to vector<5x32xf32>
    %c0_2 = arith.constant 0 : index
    %c0_3 = arith.constant 0 : index
    %2 = vector.load %arg3[%c0_2, %c0_3] : memref<5x32xf32, #tpu.memory_space<vmem>>, vector<5x32xf32>
    %3 = arith.addf %1, %2 : vector<5x32xf32>
    %4 = arith.truncf %3 : vector<5x32xf32> to vector<5x32xbf16>
    %c0_4 = arith.constant 0 : index
    %c0_5 = arith.constant 0 : index
    %5 = vector.load %arg4[%c0_4, %c0_5] : memref<32x96xbf16, #tpu.memory_space<vmem>>, vector<32x96xbf16>
    %cst = arith.constant dense<0.000000e+00> : vector<5x96xf32>
    %6 = tpu.matmul %4, %5, %cst {dimension_numbers = #tpu.dot_dimension_numbers<[1], [0], [0], [1], [0, 0, 1, 1], [], []>} : vector<5x32xbf16>, vector<32x96xbf16>, vector<5x96xf32> -> vector<5x96xf32>
    %c0_6 = arith.constant 0 : index
    %c0_7 = arith.constant 0 : index
    %7 = vector.load %arg5[%c0_6, %c0_7] : memref<1x96xf32, #tpu.memory_space<vmem>>, vector<1x96xf32>
    %8 = vector.broadcast %7 : vector<1x96xf32> to vector<5x96xf32>
    %9 = arith.addf %6, %8 : vector<5x96xf32>
    %10 = vector.extract_strided_slice %9 {offsets = [0, 0], sizes = [5, 8], strides = [1, 1]} : vector<5x96xf32> to vector<5x8xf32>
    %11 = arith.truncf %10 : vector<5x8xf32> to vector<5x8xbf16>
    %c0_8 = arith.constant 0 : index
    %c0_9 = arith.constant 0 : index
    %c0_10 = arith.constant 0 : index
    %c0_11 = arith.constant 0 : index
    %12 = vector.load %arg6[%c0_8, %c0_9, %c0_10, %c0_11] : memref<1x4x5x8xbf16, #tpu.memory_space<vmem>>, vector<1x1x5x8xbf16>
    %13 = vector.shape_cast %12 : vector<1x1x5x8xbf16> to vector<5x8xbf16>
    %14 = vector.shape_cast %11 : vector<5x8xbf16> to vector<1x1x5x8xbf16>
    tpu.vector_store %arg6[%c0_8, %c0_9, %c0_10, %c0_11], %14 {strides = array<i32>} : memref<1x4x5x8xbf16, #tpu.memory_space<vmem>>, vector<1x1x5x8xbf16>,
    %15 = vector.extract_strided_slice %9 {offsets = [0, 32], sizes = [5, 8], strides = [1, 1]} : vector<5x96xf32> to vector<5x8xf32>
    %16 = arith.truncf %15 : vector<5x8xf32> to vector<5x8xbf16>
    %c0_12 = arith.constant 0 : index
    %c0_13 = arith.constant 0 : index
    %c0_14 = arith.constant 0 : index
    %c0_15 = arith.constant 0 : index
    %17 = vector.load %arg7[%c0_12, %c0_13, %c0_14, %c0_15] : memref<1x4x5x8xbf16, #tpu.memory_space<vmem>>, vector<1x1x5x8xbf16>
    %18 = vector.shape_cast %17 : vector<1x1x5x8xbf16> to vector<5x8xbf16>
    %19 = vector.shape_cast %16 : vector<5x8xbf16> to vector<1x1x5x8xbf16>
    tpu.vector_store %arg7[%c0_12, %c0_13, %c0_14, %c0_15], %19 {strides = array<i32>} : memref<1x4x5x8xbf16, #tpu.memory_space<vmem>>, vector<1x1x5x8xbf16>,
    %20 = vector.extract_strided_slice %9 {offsets = [0, 64], sizes = [5, 8], strides = [1, 1]} : vector<5x96xf32> to vector<5x8xf32>
    %21 = arith.truncf %20 : vector<5x8xf32> to vector<5x8xbf16>
    %c0_16 = arith.constant 0 : index
    %c0_17 = arith.constant 0 : index
    %c0_18 = arith.constant 0 : index
    %c0_19 = arith.constant 0 : index
    %22 = vector.load %arg8[%c0_16, %c0_17, %c0_18, %c0_19] : memref<1x4x5x8xbf16, #tpu.memory_space<vmem>>, vector<1x1x5x8xbf16>
    %23 = vector.shape_cast %22 : vector<1x1x5x8xbf16> to vector<5x8xbf16>
    %24 = vector.shape_cast %21 : vector<5x8xbf16> to vector<1x1x5x8xbf16>
    tpu.vector_store %arg8[%c0_16, %c0_17, %c0_18, %c0_19], %24 {strides = array<i32>} : memref<1x4x5x8xbf16, #tpu.memory_space<vmem>>, vector<1x1x5x8xbf16>,
    %25 = vector.extract_strided_slice %9 {offsets = [0, 8], sizes = [5, 8], strides = [1, 1]} : vector<5x96xf32> to vector<5x8xf32>
    %26 = arith.truncf %25 : vector<5x8xf32> to vector<5x8xbf16>
    %c0_20 = arith.constant 0 : index
    %c1 = arith.constant 1 : index
    %c0_21 = arith.constant 0 : index
    %c0_22 = arith.constant 0 : index
    %27 = vector.load %arg6[%c0_20, %c1, %c0_21, %c0_22] : memref<1x4x5x8xbf16, #tpu.memory_space<vmem>>, vector<1x1x5x8xbf16>
    %28 = vector.shape_cast %27 : vector<1x1x5x8xbf16> to vector<5x8xbf16>
    %29 = vector.shape_cast %26 : vector<5x8xbf16> to vector<1x1x5x8xbf16>
    tpu.vector_store %arg6[%c0_20, %c1, %c0_21, %c0_22], %29 {strides = array<i32>} : memref<1x4x5x8xbf16, #tpu.memory_space<vmem>>, vector<1x1x5x8xbf16>,
    %30 = vector.extract_strided_slice %9 {offsets = [0, 40], sizes = [5, 8], strides = [1, 1]} : vector<5x96xf32> to vector<5x8xf32>
    %31 = arith.truncf %30 : vector<5x8xf32> to vector<5x8xbf16>
    %c0_23 = arith.constant 0 : index
    %c1_24 = arith.constant 1 : index
    %c0_25 = arith.constant 0 : index
    %c0_26 = arith.constant 0 : index
    %32 = vector.load %arg7[%c0_23, %c1_24, %c0_25, %c0_26] : memref<1x4x5x8xbf16, #tpu.memory_space<vmem>>, vector<1x1x5x8xbf16>
    %33 = vector.shape_cast %32 : vector<1x1x5x8xbf16> to vector<5x8xbf16>
    %34 = vector.shape_cast %31 : vector<5x8xbf16> to vector<1x1x5x8xbf16>
    tpu.vector_store %arg7[%c0_23, %c1_24, %c0_25, %c0_26], %34 {strides = array<i32>} : memref<1x4x5x8xbf16, #tpu.memory_space<vmem>>, vector<1x1x5x8xbf16>,
    %35 = vector.extract_strided_slice %9 {offsets = [0, 72], sizes = [5, 8], strides = [1, 1]} : vector<5x96xf32> to vector<5x8xf32>
    %36 = arith.truncf %35 : vector<5x8xf32> to vector<5x8xbf16>
    %c0_27 = arith.constant 0 : index
    %c1_28 = arith.constant 1 : index
    %c0_29 = arith.constant 0 : index
    %c0_30 = arith.constant 0 : index
    %37 = vector.load %arg8[%c0_27, %c1_28, %c0_29, %c0_30] : memref<1x4x5x8xbf16, #tpu.memory_space<vmem>>, vector<1x1x5x8xbf16>
    %38 = vector.shape_cast %37 : vector<1x1x5x8xbf16> to vector<5x8xbf16>
    %39 = vector.shape_cast %36 : vector<5x8xbf16> to vector<1x1x5x8xbf16>
    tpu.vector_store %arg8[%c0_27, %c1_28, %c0_29, %c0_30], %39 {strides = array<i32>} : memref<1x4x5x8xbf16, #tpu.memory_space<vmem>>, vector<1x1x5x8xbf16>,
    %40 = vector.extract_strided_slice %9 {offsets = [0, 16], sizes = [5, 8], strides = [1, 1]} : vector<5x96xf32> to vector<5x8xf32>
    %41 = arith.truncf %40 : vector<5x8xf32> to vector<5x8xbf16>
    %c0_31 = arith.constant 0 : index
    %c2 = arith.constant 2 : index
    %c0_32 = arith.constant 0 : index
    %c0_33 = arith.constant 0 : index
    %42 = vector.load %arg6[%c0_31, %c2, %c0_32, %c0_33] : memref<1x4x5x8xbf16, #tpu.memory_space<vmem>>, vector<1x1x5x8xbf16>
    %43 = vector.shape_cast %42 : vector<1x1x5x8xbf16> to vector<5x8xbf16>
    %44 = vector.shape_cast %41 : vector<5x8xbf16> to vector<1x1x5x8xbf16>
    tpu.vector_store %arg6[%c0_31, %c2, %c0_32, %c0_33], %44 {strides = array<i32>} : memref<1x4x5x8xbf16, #tpu.memory_space<vmem>>, vector<1x1x5x8xbf16>,
    %45 = vector.extract_strided_slice %9 {offsets = [0, 48], sizes = [5, 8], strides = [1, 1]} : vector<5x96xf32> to vector<5x8xf32>
    %46 = arith.truncf %45 : vector<5x8xf32> to vector<5x8xbf16>
    %c0_34 = arith.constant 0 : index
    %c2_35 = arith.constant 2 : index
    %c0_36 = arith.constant 0 : index
    %c0_37 = arith.constant 0 : index
    %47 = vector.load %arg7[%c0_34, %c2_35, %c0_36, %c0_37] : memref<1x4x5x8xbf16, #tpu.memory_space<vmem>>, vector<1x1x5x8xbf16>
    %48 = vector.shape_cast %47 : vector<1x1x5x8xbf16> to vector<5x8xbf16>
    %49 = vector.shape_cast %46 : vector<5x8xbf16> to vector<1x1x5x8xbf16>
    tpu.vector_store %arg7[%c0_34, %c2_35, %c0_36, %c0_37], %49 {strides = array<i32>} : memref<1x4x5x8xbf16, #tpu.memory_space<vmem>>, vector<1x1x5x8xbf16>,
    %50 = vector.extract_strided_slice %9 {offsets = [0, 80], sizes = [5, 8], strides = [1, 1]} : vector<5x96xf32> to vector<5x8xf32>
    %51 = arith.truncf %50 : vector<5x8xf32> to vector<5x8xbf16>
    %c0_38 = arith.constant 0 : index
    %c2_39 = arith.constant 2 : index
    %c0_40 = arith.constant 0 : index
    %c0_41 = arith.constant 0 : index
    %52 = vector.load %arg8[%c0_38, %c2_39, %c0_40, %c0_41] : memref<1x4x5x8xbf16, #tpu.memory_space<vmem>>, vector<1x1x5x8xbf16>
    %53 = vector.shape_cast %52 : vector<1x1x5x8xbf16> to vector<5x8xbf16>
    %54 = vector.shape_cast %51 : vector<5x8xbf16> to vector<1x1x5x8xbf16>
    tpu.vector_store %arg8[%c0_38, %c2_39, %c0_40, %c0_41], %54 {strides = array<i32>} : memref<1x4x5x8xbf16, #tpu.memory_space<vmem>>, vector<1x1x5x8xbf16>,
    %55 = vector.extract_strided_slice %9 {offsets = [0, 24], sizes = [5, 8], strides = [1, 1]} : vector<5x96xf32> to vector<5x8xf32>
    %56 = arith.truncf %55 : vector<5x8xf32> to vector<5x8xbf16>
    %c0_42 = arith.constant 0 : index
    %c3 = arith.constant 3 : index
    %c0_43 = arith.constant 0 : index
    %c0_44 = arith.constant 0 : index
    %57 = vector.load %arg6[%c0_42, %c3, %c0_43, %c0_44] : memref<1x4x5x8xbf16, #tpu.memory_space<vmem>>, vector<1x1x5x8xbf16>
    %58 = vector.shape_cast %57 : vector<1x1x5x8xbf16> to vector<5x8xbf16>
    %59 = vector.shape_cast %56 : vector<5x8xbf16> to vector<1x1x5x8xbf16>
    tpu.vector_store %arg6[%c0_42, %c3, %c0_43, %c0_44], %59 {strides = array<i32>} : memref<1x4x5x8xbf16, #tpu.memory_space<vmem>>, vector<1x1x5x8xbf16>,
    %60 = vector.extract_strided_slice %9 {offsets = [0, 56], sizes = [5, 8], strides = [1, 1]} : vector<5x96xf32> to vector<5x8xf32>
    %61 = arith.truncf %60 : vector<5x8xf32> to vector<5x8xbf16>
    %c0_45 = arith.constant 0 : index
    %c3_46 = arith.constant 3 : index
    %c0_47 = arith.constant 0 : index
    %c0_48 = arith.constant 0 : index
    %62 = vector.load %arg7[%c0_45, %c3_46, %c0_47, %c0_48] : memref<1x4x5x8xbf16, #tpu.memory_space<vmem>>, vector<1x1x5x8xbf16>
    %63 = vector.shape_cast %62 : vector<1x1x5x8xbf16> to vector<5x8xbf16>
    %64 = vector.shape_cast %61 : vector<5x8xbf16> to vector<1x1x5x8xbf16>
    tpu.vector_store %arg7[%c0_45, %c3_46, %c0_47, %c0_48], %64 {strides = array<i32>} : memref<1x4x5x8xbf16, #tpu.memory_space<vmem>>, vector<1x1x5x8xbf16>,
    %65 = vector.extract_strided_slice %9 {offsets = [0, 88], sizes = [5, 8], strides = [1, 1]} : vector<5x96xf32> to vector<5x8xf32>
    %66 = arith.truncf %65 : vector<5x8xf32> to vector<5x8xbf16>
    %c0_49 = arith.constant 0 : index
    %c3_50 = arith.constant 3 : index
    %c0_51 = arith.constant 0 : index
    %c0_52 = arith.constant 0 : index
    %67 = vector.load %arg8[%c0_49, %c3_50, %c0_51, %c0_52] : memref<1x4x5x8xbf16, #tpu.memory_space<vmem>>, vector<1x1x5x8xbf16>
    %68 = vector.shape_cast %67 : vector<1x1x5x8xbf16> to vector<5x8xbf16>
    %69 = vector.shape_cast %66 : vector<5x8xbf16> to vector<1x1x5x8xbf16>
    tpu.vector_store %arg8[%c0_49, %c3_50, %c0_51, %c0_52], %69 {strides = array<i32>} : memref<1x4x5x8xbf16, #tpu.memory_space<vmem>>, vector<1x1x5x8xbf16>,
    return
  }
  func.func @transform_0(%arg0: i32, %arg1: i32) -> (i32, i32, i32) {
    %c0_i32 = arith.constant 0 : i32
    %c0_i32_0 = arith.constant 0 : i32
    return %arg0, %arg1, %c0_i32 : i32, i32, i32
  }
  func.func @transform_1(%arg0: i32, %arg1: i32) -> (i32, i32) {
    %c0_i32 = arith.constant 0 : i32
    %c0_i32_0 = arith.constant 0 : i32
    return %arg1, %c0_i32 : i32, i32
  }
  func.func @transform_2(%arg0: i32, %arg1: i32) -> (i32, i32) {
    %c0_i32 = arith.constant 0 : i32
    %c0_i32_0 = arith.constant 0 : i32
    %c0_i32_1 = arith.constant 0 : i32
    return %c0_i32, %c0_i32_0 : i32, i32
  }
  func.func @transform_3(%arg0: i32, %arg1: i32) -> (i32, i32) {
    %c0_i32 = arith.constant 0 : i32
    %c0_i32_0 = arith.constant 0 : i32
    %c0_i32_1 = arith.constant 0 : i32
    return %c0_i32, %c0_i32_0 : i32, i32
  }
  func.func @transform_4(%arg0: i32, %arg1: i32) -> (i32, i32, i32, i32) {
    %c0_i32 = arith.constant 0 : i32
    %c0_i32_0 = arith.constant 0 : i32
    %c0_i32_1 = arith.constant 0 : i32
    return %arg0, %c0_i32, %arg1, %c0_i32_0 : i32, i32, i32, i32
  }
  func.func @transform_5(%arg0: i32, %arg1: i32) -> (i32, i32, i32, i32) {
    %c0_i32 = arith.constant 0 : i32
    %c0_i32_0 = arith.constant 0 : i32
    %c0_i32_1 = arith.constant 0 : i32
    return %arg0, %c0_i32, %arg1, %c0_i32_0 : i32, i32, i32, i32
  }
  func.func @transform_6(%arg0: i32, %arg1: i32) -> (i32, i32, i32, i32) {
    %c0_i32 = arith.constant 0 : i32
    %c0_i32_0 = arith.constant 0 : i32
    %c0_i32_1 = arith.constant 0 : i32
    return %arg0, %c0_i32, %arg1, %c0_i32_0 : i32, i32, i32, i32
  }
}

module attributes {stable_mosaic.version = 11 : i64} {
  func.func @_attn_kernel(%arg0: i32, %arg1: i32, %arg2: memref<1x1x5x8xbf16, #tpu.memory_space<vmem>>, %arg3: memref<1x1x5x8xbf16, #tpu.memory_space<vmem>>, %arg4: memref<1x1x5x8xbf16, #tpu.memory_space<vmem>>, %arg5: memref<1x1x5x8xbf16, #tpu.memory_space<vmem>>, %arg6: memref<1x1x5x5xf32, #tpu.memory_space<vmem>>) attributes {dimension_semantics = [#tpu.dimension_semantics<parallel>, #tpu.dimension_semantics<parallel>], iteration_bounds = array<i64: 2, 4>, scalar_prefetch = 0 : i64, scratch_operands = 0 : i64, tpu.core_type = #tpu.core_type<tc>, window_params = [{transform_indices = @transform_0, window_bounds = array<i64: 1, 1, 5, 8>}, {transform_indices = @transform_1, window_bounds = array<i64: 1, 1, 5, 8>}, {transform_indices = @transform_2, window_bounds = array<i64: 1, 1, 5, 8>}, {transform_indices = @transform_3, window_bounds = array<i64: 1, 1, 5, 8>}, {transform_indices = @transform_4, window_bounds = array<i64: 1, 1, 5, 5>}]} {
    %c0 = arith.constant 0 : index
    %c0_0 = arith.constant 0 : index
    %c0_1 = arith.constant 0 : index
    %c0_2 = arith.constant 0 : index
    %0 = vector.load %arg2[%c0, %c0_0, %c0_1, %c0_2] : memref<1x1x5x8xbf16, #tpu.memory_space<vmem>>, vector<1x1x5x8xbf16>
    %1 = vector.shape_cast %0 : vector<1x1x5x8xbf16> to vector<5x8xbf16>
    %c0_3 = arith.constant 0 : index
    %c0_4 = arith.constant 0 : index
    %c0_5 = arith.constant 0 : index
    %c0_6 = arith.constant 0 : index
    %2 = vector.load %arg3[%c0_3, %c0_4, %c0_5, %c0_6] : memref<1x1x5x8xbf16, #tpu.memory_space<vmem>>, vector<1x1x5x8xbf16>
    %3 = vector.shape_cast %2 : vector<1x1x5x8xbf16> to vector<5x8xbf16>
    %c0_7 = arith.constant 0 : index
    %c0_8 = arith.constant 0 : index
    %c0_9 = arith.constant 0 : index
    %c0_10 = arith.constant 0 : index
    %4 = vector.load %arg4[%c0_7, %c0_8, %c0_9, %c0_10] : memref<1x1x5x8xbf16, #tpu.memory_space<vmem>>, vector<1x1x5x8xbf16>
    %5 = vector.shape_cast %4 : vector<1x1x5x8xbf16> to vector<5x8xbf16>
    %cst = arith.constant dense<0.000000e+00> : vector<5x5xf32>
    %6 = tpu.matmul %1, %3, %cst {dimension_numbers = #tpu.dot_dimension_numbers<[1], [1], [0], [0], [0, 0, 1, 0], [], []>} : vector<5x8xbf16>, vector<5x8xbf16>, vector<5x5xf32> -> vector<5x5xf32>
    %cst_11 = arith.constant 0.353553385 : f32
    %7 = vector.broadcast %cst_11 : f32 to vector<5x5xf32>
    %8 = arith.mulf %6, %7 : vector<5x5xf32>
    %cst_12 = arith.constant dense<0xFF800000> : vector<5xf32>
    %9 = vector.multi_reduction <maximumf>, %8, %cst_12 [1] : vector<5x5xf32> to vector<5xf32>
    %10 = vector.shape_cast %9 : vector<5xf32> to vector<5x1xf32>
    %11 = vector.broadcast %10 : vector<5x1xf32> to vector<5x5xf32>
    %12 = arith.subf %8, %11 : vector<5x5xf32>
    %13 = math.exp %12 : vector<5x5xf32>
    %cst_13 = arith.constant dense<0.000000e+00> : vector<5xf32>
    %14 = vector.multi_reduction <add>, %13, %cst_13 [1] : vector<5x5xf32> to vector<5xf32>
    %15 = vector.shape_cast %14 : vector<5xf32> to vector<5x1xf32>
    %16 = vector.broadcast %15 : vector<5x1xf32> to vector<5x5xf32>
    %17 = arith.divf %13, %16 : vector<5x5xf32>
    %c0_14 = arith.constant 0 : index
    %c0_15 = arith.constant 0 : index
    %c0_16 = arith.constant 0 : index
    %c0_17 = arith.constant 0 : index
    %18 = vector.load %arg6[%c0_14, %c0_15, %c0_16, %c0_17] : memref<1x1x5x5xf32, #tpu.memory_space<vmem>>, vector<1x1x5x5xf32>
    %19 = vector.shape_cast %18 : vector<1x1x5x5xf32> to vector<5x5xf32>
    %20 = vector.shape_cast %17 : vector<5x5xf32> to vector<1x1x5x5xf32>
    tpu.vector_store %arg6[%c0_14, %c0_15, %c0_16, %c0_17], %20 {strides = array<i32>} : memref<1x1x5x5xf32, #tpu.memory_space<vmem>>, vector<1x1x5x5xf32>,
    %21 = arith.truncf %17 : vector<5x5xf32> to vector<5x5xbf16>
    %cst_18 = arith.constant dense<0.000000e+00> : vector<5x8xf32>
    %22 = tpu.matmul %21, %5, %cst_18 {dimension_numbers = #tpu.dot_dimension_numbers<[1], [0], [0], [1], [0, 0, 1, 1], [], []>} : vector<5x5xbf16>, vector<5x8xbf16>, vector<5x8xf32> -> vector<5x8xf32>
    %23 = arith.truncf %22 : vector<5x8xf32> to vector<5x8xbf16>
    %c0_19 = arith.constant 0 : index
    %c0_20 = arith.constant 0 : index
    %c0_21 = arith.constant 0 : index
    %c0_22 = arith.constant 0 : index
    %24 = vector.load %arg5[%c0_19, %c0_20, %c0_21, %c0_22] : memref<1x1x5x8xbf16, #tpu.memory_space<vmem>>, vector<1x1x5x8xbf16>
    %25 = vector.shape_cast %24 : vector<1x1x5x8xbf16> to vector<5x8xbf16>
    %26 = vector.shape_cast %23 : vector<5x8xbf16> to vector<1x1x5x8xbf16>
    tpu.vector_store %arg5[%c0_19, %c0_20, %c0_21, %c0_22], %26 {strides = array<i32>} : memref<1x1x5x8xbf16, #tpu.memory_space<vmem>>, vector<1x1x5x8xbf16>,
    return
  }
  func.func @transform_0(%arg0: i32, %arg1: i32) -> (i32, i32, i32, i32) {
    %c0_i32 = arith.constant 0 : i32
    %c0_i32_0 = arith.constant 0 : i32
    %c0_i32_1 = arith.constant 0 : i32
    return %arg0, %arg1, %c0_i32, %c0_i32_0 : i32, i32, i32, i32
  }
  func.func @transform_1(%arg0: i32, %arg1: i32) -> (i32, i32, i32, i32) {
    %c0_i32 = arith.constant 0 : i32
    %c0_i32_0 = arith.constant 0 : i32
    %c0_i32_1 = arith.constant 0 : i32
    return %arg0, %arg1, %c0_i32, %c0_i32_0 : i32, i32, i32, i32
  }
  func.func @transform_2(%arg0: i32, %arg1: i32) -> (i32, i32, i32, i32) {
    %c0_i32 = arith.constant 0 : i32
    %c0_i32_0 = arith.constant 0 : i32
    %c0_i32_1 = arith.constant 0 : i32
    return %arg0, %arg1, %c0_i32, %c0_i32_0 : i32, i32, i32, i32
  }
  func.func @transform_3(%arg0: i32, %arg1: i32) -> (i32, i32, i32, i32) {
    %c0_i32 = arith.constant 0 : i32
    %c0_i32_0 = arith.constant 0 : i32
    %c0_i32_1 = arith.constant 0 : i32
    return %arg0, %arg1, %c0_i32, %c0_i32_0 : i32, i32, i32, i32
  }
  func.func @transform_4(%arg0: i32, %arg1: i32) -> (i32, i32, i32, i32) {
    %c0_i32 = arith.constant 0 : i32
    %c0_i32_0 = arith.constant 0 : i32
    %c0_i32_1 = arith.constant 0 : i32
    return %arg0, %arg1, %c0_i32, %c0_i32_0 : i32, i32, i32, i32
  }
}

module attributes {stable_mosaic.version = 11 : i64} {
  func.func @_proj_res_ln_kernel(%arg0: i32, %arg1: i32, %arg2: memref<1x4x5x8xbf16, #tpu.memory_space<vmem>>, %arg3: memref<1x5x32xf32, #tpu.memory_space<vmem>>, %arg4: memref<5x32xf32, #tpu.memory_space<vmem>>, %arg5: memref<4x8x32xbf16, #tpu.memory_space<vmem>>, %arg6: memref<1x32xf32, #tpu.memory_space<vmem>>, %arg7: memref<1x32xf32, #tpu.memory_space<vmem>>, %arg8: memref<1x32xf32, #tpu.memory_space<vmem>>, %arg9: memref<1x5x32xf32, #tpu.memory_space<vmem>>) attributes {dimension_semantics = [#tpu.dimension_semantics<parallel>, #tpu.dimension_semantics<parallel>], iteration_bounds = array<i64: 2, 1>, scalar_prefetch = 0 : i64, scratch_operands = 0 : i64, tpu.core_type = #tpu.core_type<tc>, window_params = [{transform_indices = @transform_0, window_bounds = array<i64: 1, 4, 5, 8>}, {transform_indices = @transform_1, window_bounds = array<i64: 1, 5, 32>}, {transform_indices = @transform_2, window_bounds = array<i64: 5, 32>}, {pipeline_mode = #tpu.pipeline_mode<synchronous>, transform_indices = @transform_3, window_bounds = array<i64: 4, 8, 32>}, {pipeline_mode = #tpu.pipeline_mode<synchronous>, transform_indices = @transform_4, window_bounds = array<i64: 1, 32>}, {pipeline_mode = #tpu.pipeline_mode<synchronous>, transform_indices = @transform_5, window_bounds = array<i64: 1, 32>}, {pipeline_mode = #tpu.pipeline_mode<synchronous>, transform_indices = @transform_6, window_bounds = array<i64: 1, 32>}, {transform_indices = @transform_7, window_bounds = array<i64: 1, 5, 32>}]} {
    %c0 = arith.constant 0 : index
    %c0_0 = arith.constant 0 : index
    %c0_1 = arith.constant 0 : index
    %0 = vector.load %arg3[%c0, %c0_0, %c0_1] : memref<1x5x32xf32, #tpu.memory_space<vmem>>, vector<1x5x32xf32>
    %1 = vector.shape_cast %0 : vector<1x5x32xf32> to vector<5x32xf32>
    %c0_2 = arith.constant 0 : index
    %c0_3 = arith.constant 0 : index
    %2 = vector.load %arg4[%c0_2, %c0_3] : memref<5x32xf32, #tpu.memory_space<vmem>>, vector<5x32xf32>
    %3 = arith.addf %1, %2 : vector<5x32xf32>
    %c0_4 = arith.constant 0 : index
    %c0_5 = arith.constant 0 : index
    %4 = vector.load %arg6[%c0_4, %c0_5] : memref<1x32xf32, #tpu.memory_space<vmem>>, vector<1x32xf32>
    %5 = vector.broadcast %4 : vector<1x32xf32> to vector<5x32xf32>
    %6 = arith.addf %3, %5 : vector<5x32xf32>
    %c0_6 = arith.constant 0 : index
    %c0_7 = arith.constant 0 : index
    %c0_8 = arith.constant 0 : index
    %c0_9 = arith.constant 0 : index
    %7 = vector.load %arg2[%c0_6, %c0_7, %c0_8, %c0_9] : memref<1x4x5x8xbf16, #tpu.memory_space<vmem>>, vector<1x1x5x8xbf16>
    %8 = vector.shape_cast %7 : vector<1x1x5x8xbf16> to vector<5x8xbf16>
    %c0_10 = arith.constant 0 : index
    %c0_11 = arith.constant 0 : index
    %c0_12 = arith.constant 0 : index
    %9 = vector.load %arg5[%c0_10, %c0_11, %c0_12] : memref<4x8x32xbf16, #tpu.memory_space<vmem>>, vector<1x8x32xbf16>
    %10 = vector.shape_cast %9 : vector<1x8x32xbf16> to vector<8x32xbf16>
    %cst = arith.constant dense<0.000000e+00> : vector<5x32xf32>
    %11 = tpu.matmul %8, %10, %cst {dimension_numbers = #tpu.dot_dimension_numbers<[1], [0], [0], [1], [0, 0, 1, 1], [], []>} : vector<5x8xbf16>, vector<8x32xbf16>, vector<5x32xf32> -> vector<5x32xf32>
    %12 = arith.addf %6, %11 : vector<5x32xf32>
    %c0_13 = arith.constant 0 : index
    %c1 = arith.constant 1 : index
    %c0_14 = arith.constant 0 : index
    %c0_15 = arith.constant 0 : index
    %13 = vector.load %arg2[%c0_13, %c1, %c0_14, %c0_15] : memref<1x4x5x8xbf16, #tpu.memory_space<vmem>>, vector<1x1x5x8xbf16>
    %14 = vector.shape_cast %13 : vector<1x1x5x8xbf16> to vector<5x8xbf16>
    %c1_16 = arith.constant 1 : index
    %c0_17 = arith.constant 0 : index
    %c0_18 = arith.constant 0 : index
    %15 = vector.load %arg5[%c1_16, %c0_17, %c0_18] : memref<4x8x32xbf16, #tpu.memory_space<vmem>>, vector<1x8x32xbf16>
    %16 = vector.shape_cast %15 : vector<1x8x32xbf16> to vector<8x32xbf16>
    %cst_19 = arith.constant dense<0.000000e+00> : vector<5x32xf32>
    %17 = tpu.matmul %14, %16, %cst_19 {dimension_numbers = #tpu.dot_dimension_numbers<[1], [0], [0], [1], [0, 0, 1, 1], [], []>} : vector<5x8xbf16>, vector<8x32xbf16>, vector<5x32xf32> -> vector<5x32xf32>
    %18 = arith.addf %12, %17 : vector<5x32xf32>
    %c0_20 = arith.constant 0 : index
    %c2 = arith.constant 2 : index
    %c0_21 = arith.constant 0 : index
    %c0_22 = arith.constant 0 : index
    %19 = vector.load %arg2[%c0_20, %c2, %c0_21, %c0_22] : memref<1x4x5x8xbf16, #tpu.memory_space<vmem>>, vector<1x1x5x8xbf16>
    %20 = vector.shape_cast %19 : vector<1x1x5x8xbf16> to vector<5x8xbf16>
    %c2_23 = arith.constant 2 : index
    %c0_24 = arith.constant 0 : index
    %c0_25 = arith.constant 0 : index
    %21 = vector.load %arg5[%c2_23, %c0_24, %c0_25] : memref<4x8x32xbf16, #tpu.memory_space<vmem>>, vector<1x8x32xbf16>
    %22 = vector.shape_cast %21 : vector<1x8x32xbf16> to vector<8x32xbf16>
    %cst_26 = arith.constant dense<0.000000e+00> : vector<5x32xf32>
    %23 = tpu.matmul %20, %22, %cst_26 {dimension_numbers = #tpu.dot_dimension_numbers<[1], [0], [0], [1], [0, 0, 1, 1], [], []>} : vector<5x8xbf16>, vector<8x32xbf16>, vector<5x32xf32> -> vector<5x32xf32>
    %24 = arith.addf %18, %23 : vector<5x32xf32>
    %c0_27 = arith.constant 0 : index
    %c3 = arith.constant 3 : index
    %c0_28 = arith.constant 0 : index
    %c0_29 = arith.constant 0 : index
    %25 = vector.load %arg2[%c0_27, %c3, %c0_28, %c0_29] : memref<1x4x5x8xbf16, #tpu.memory_space<vmem>>, vector<1x1x5x8xbf16>
    %26 = vector.shape_cast %25 : vector<1x1x5x8xbf16> to vector<5x8xbf16>
    %c3_30 = arith.constant 3 : index
    %c0_31 = arith.constant 0 : index
    %c0_32 = arith.constant 0 : index
    %27 = vector.load %arg5[%c3_30, %c0_31, %c0_32] : memref<4x8x32xbf16, #tpu.memory_space<vmem>>, vector<1x8x32xbf16>
    %28 = vector.shape_cast %27 : vector<1x8x32xbf16> to vector<8x32xbf16>
    %cst_33 = arith.constant dense<0.000000e+00> : vector<5x32xf32>
    %29 = tpu.matmul %26, %28, %cst_33 {dimension_numbers = #tpu.dot_dimension_numbers<[1], [0], [0], [1], [0, 0, 1, 1], [], []>} : vector<5x8xbf16>, vector<8x32xbf16>, vector<5x32xf32> -> vector<5x32xf32>
    %30 = arith.addf %24, %29 : vector<5x32xf32>
    %cst_34 = arith.constant dense<0.000000e+00> : vector<5xf32>
    %31 = vector.multi_reduction <add>, %30, %cst_34 [1] : vector<5x32xf32> to vector<5xf32>
    %32 = vector.shape_cast %31 : vector<5xf32> to vector<5x1xf32>
    %cst_35 = arith.constant 3.200000e+01 : f32
    %33 = vector.broadcast %cst_35 : f32 to vector<5x1xf32>
    %34 = arith.divf %32, %33 : vector<5x1xf32>
    %35 = vector.broadcast %34 : vector<5x1xf32> to vector<5x32xf32>
    %36 = arith.subf %30, %35 : vector<5x32xf32>
    %37 = arith.mulf %36, %36 : vector<5x32xf32>
    %cst_36 = arith.constant dense<0.000000e+00> : vector<5xf32>
    %38 = vector.multi_reduction <add>, %37, %cst_36 [1] : vector<5x32xf32> to vector<5xf32>
    %39 = vector.shape_cast %38 : vector<5xf32> to vector<5x1xf32>
    %cst_37 = arith.constant 3.200000e+01 : f32
    %40 = vector.broadcast %cst_37 : f32 to vector<5x1xf32>
    %41 = arith.divf %39, %40 : vector<5x1xf32>
    %42 = vector.broadcast %34 : vector<5x1xf32> to vector<5x32xf32>
    %43 = arith.subf %30, %42 : vector<5x32xf32>
    %cst_38 = arith.constant 9.99999974E-6 : f32
    %44 = vector.broadcast %cst_38 : f32 to vector<5x1xf32>
    %45 = arith.addf %41, %44 : vector<5x1xf32>
    %46 = math.rsqrt %45 : vector<5x1xf32>
    %47 = vector.broadcast %46 : vector<5x1xf32> to vector<5x32xf32>
    %48 = arith.mulf %43, %47 : vector<5x32xf32>
    %c0_39 = arith.constant 0 : index
    %c0_40 = arith.constant 0 : index
    %49 = vector.load %arg7[%c0_39, %c0_40] : memref<1x32xf32, #tpu.memory_space<vmem>>, vector<1x32xf32>
    %50 = vector.broadcast %49 : vector<1x32xf32> to vector<5x32xf32>
    %51 = arith.mulf %48, %50 : vector<5x32xf32>
    %c0_41 = arith.constant 0 : index
    %c0_42 = arith.constant 0 : index
    %52 = vector.load %arg8[%c0_41, %c0_42] : memref<1x32xf32, #tpu.memory_space<vmem>>, vector<1x32xf32>
    %53 = vector.broadcast %52 : vector<1x32xf32> to vector<5x32xf32>
    %54 = arith.addf %51, %53 : vector<5x32xf32>
    %c0_43 = arith.constant 0 : index
    %c0_44 = arith.constant 0 : index
    %c0_45 = arith.constant 0 : index
    %55 = vector.load %arg9[%c0_43, %c0_44, %c0_45] : memref<1x5x32xf32, #tpu.memory_space<vmem>>, vector<1x5x32xf32>
    %56 = vector.shape_cast %55 : vector<1x5x32xf32> to vector<5x32xf32>
    %57 = vector.shape_cast %54 : vector<5x32xf32> to vector<1x5x32xf32>
    tpu.vector_store %arg9[%c0_43, %c0_44, %c0_45], %57 {strides = array<i32>} : memref<1x5x32xf32, #tpu.memory_space<vmem>>, vector<1x5x32xf32>,
    return
  }
  func.func @transform_0(%arg0: i32, %arg1: i32) -> (i32, i32, i32, i32) {
    %c0_i32 = arith.constant 0 : i32
    %c0_i32_0 = arith.constant 0 : i32
    %c0_i32_1 = arith.constant 0 : i32
    return %arg0, %c0_i32, %arg1, %c0_i32_0 : i32, i32, i32, i32
  }
  func.func @transform_1(%arg0: i32, %arg1: i32) -> (i32, i32, i32) {
    %c0_i32 = arith.constant 0 : i32
    %c0_i32_0 = arith.constant 0 : i32
    return %arg0, %arg1, %c0_i32 : i32, i32, i32
  }
  func.func @transform_2(%arg0: i32, %arg1: i32) -> (i32, i32) {
    %c0_i32 = arith.constant 0 : i32
    %c0_i32_0 = arith.constant 0 : i32
    return %arg1, %c0_i32 : i32, i32
  }
  func.func @transform_3(%arg0: i32, %arg1: i32) -> (i32, i32, i32) {
    %c0_i32 = arith.constant 0 : i32
    %c0_i32_0 = arith.constant 0 : i32
    %c0_i32_1 = arith.constant 0 : i32
    %c0_i32_2 = arith.constant 0 : i32
    return %c0_i32, %c0_i32_0, %c0_i32_1 : i32, i32, i32
  }
  func.func @transform_4(%arg0: i32, %arg1: i32) -> (i32, i32) {
    %c0_i32 = arith.constant 0 : i32
    %c0_i32_0 = arith.constant 0 : i32
    %c0_i32_1 = arith.constant 0 : i32
    return %c0_i32, %c0_i32_0 : i32, i32
  }
  func.func @transform_5(%arg0: i32, %arg1: i32) -> (i32, i32) {
    %c0_i32 = arith.constant 0 : i32
    %c0_i32_0 = arith.constant 0 : i32
    %c0_i32_1 = arith.constant 0 : i32
    return %c0_i32, %c0_i32_0 : i32, i32
  }
  func.func @transform_6(%arg0: i32, %arg1: i32) -> (i32, i32) {
    %c0_i32 = arith.constant 0 : i32
    %c0_i32_0 = arith.constant 0 : i32
    %c0_i32_1 = arith.constant 0 : i32
    return %c0_i32, %c0_i32_0 : i32, i32
  }
  func.func @transform_7(%arg0: i32, %arg1: i32) -> (i32, i32, i32) {
    %c0_i32 = arith.constant 0 : i32
    %c0_i32_0 = arith.constant 0 : i32
    return %arg0, %arg1, %c0_i32 : i32, i32, i32
  }
}

module attributes {stable_mosaic.version = 11 : i64} {
  func.func @_ffn_res_ln_kernel(%arg0: i32, %arg1: memref<10x32xf32, #tpu.memory_space<vmem>>, %arg2: memref<32x64xbf16, #tpu.memory_space<vmem>>, %arg3: memref<1x64xf32, #tpu.memory_space<vmem>>, %arg4: memref<64x32xbf16, #tpu.memory_space<vmem>>, %arg5: memref<1x32xf32, #tpu.memory_space<vmem>>, %arg6: memref<1x32xf32, #tpu.memory_space<vmem>>, %arg7: memref<1x32xf32, #tpu.memory_space<vmem>>, %arg8: memref<10x32xf32, #tpu.memory_space<vmem>>) attributes {dimension_semantics = [#tpu.dimension_semantics<parallel>], iteration_bounds = array<i64: 1>, scalar_prefetch = 0 : i64, scratch_operands = 0 : i64, tpu.core_type = #tpu.core_type<tc>, window_params = [{transform_indices = @transform_0, window_bounds = array<i64: 10, 32>}, {pipeline_mode = #tpu.pipeline_mode<synchronous>, transform_indices = @transform_1, window_bounds = array<i64: 32, 64>}, {pipeline_mode = #tpu.pipeline_mode<synchronous>, transform_indices = @transform_2, window_bounds = array<i64: 1, 64>}, {pipeline_mode = #tpu.pipeline_mode<synchronous>, transform_indices = @transform_3, window_bounds = array<i64: 64, 32>}, {pipeline_mode = #tpu.pipeline_mode<synchronous>, transform_indices = @transform_4, window_bounds = array<i64: 1, 32>}, {pipeline_mode = #tpu.pipeline_mode<synchronous>, transform_indices = @transform_5, window_bounds = array<i64: 1, 32>}, {pipeline_mode = #tpu.pipeline_mode<synchronous>, transform_indices = @transform_6, window_bounds = array<i64: 1, 32>}, {transform_indices = @transform_7, window_bounds = array<i64: 10, 32>}]} {
    %c0 = arith.constant 0 : index
    %c0_0 = arith.constant 0 : index
    %0 = vector.load %arg1[%c0, %c0_0] : memref<10x32xf32, #tpu.memory_space<vmem>>, vector<10x32xf32>
    %1 = arith.truncf %0 : vector<10x32xf32> to vector<10x32xbf16>
    %c0_1 = arith.constant 0 : index
    %c0_2 = arith.constant 0 : index
    %2 = vector.load %arg2[%c0_1, %c0_2] : memref<32x64xbf16, #tpu.memory_space<vmem>>, vector<32x64xbf16>
    %cst = arith.constant dense<0.000000e+00> : vector<10x64xf32>
    %3 = tpu.matmul %1, %2, %cst {dimension_numbers = #tpu.dot_dimension_numbers<[1], [0], [0], [1], [0, 0, 1, 1], [], []>} : vector<10x32xbf16>, vector<32x64xbf16>, vector<10x64xf32> -> vector<10x64xf32>
    %c0_3 = arith.constant 0 : index
    %c0_4 = arith.constant 0 : index
    %4 = vector.load %arg3[%c0_3, %c0_4] : memref<1x64xf32, #tpu.memory_space<vmem>>, vector<1x64xf32>
    %5 = vector.broadcast %4 : vector<1x64xf32> to vector<10x64xf32>
    %6 = arith.addf %3, %5 : vector<10x64xf32>
    %cst_5 = arith.constant 0.000000e+00 : f32
    %7 = vector.broadcast %cst_5 : f32 to vector<10x64xf32>
    %8 = arith.maximumf %6, %7 : vector<10x64xf32>
    %9 = arith.truncf %8 : vector<10x64xf32> to vector<10x64xbf16>
    %c0_6 = arith.constant 0 : index
    %c0_7 = arith.constant 0 : index
    %10 = vector.load %arg4[%c0_6, %c0_7] : memref<64x32xbf16, #tpu.memory_space<vmem>>, vector<64x32xbf16>
    %cst_8 = arith.constant dense<0.000000e+00> : vector<10x32xf32>
    %11 = tpu.matmul %9, %10, %cst_8 {dimension_numbers = #tpu.dot_dimension_numbers<[1], [0], [0], [1], [0, 0, 1, 1], [], []>} : vector<10x64xbf16>, vector<64x32xbf16>, vector<10x32xf32> -> vector<10x32xf32>
    %12 = arith.addf %0, %11 : vector<10x32xf32>
    %c0_9 = arith.constant 0 : index
    %c0_10 = arith.constant 0 : index
    %13 = vector.load %arg5[%c0_9, %c0_10] : memref<1x32xf32, #tpu.memory_space<vmem>>, vector<1x32xf32>
    %14 = vector.broadcast %13 : vector<1x32xf32> to vector<10x32xf32>
    %15 = arith.addf %12, %14 : vector<10x32xf32>
    %cst_11 = arith.constant dense<0.000000e+00> : vector<10xf32>
    %16 = vector.multi_reduction <add>, %15, %cst_11 [1] : vector<10x32xf32> to vector<10xf32>
    %17 = vector.shape_cast %16 : vector<10xf32> to vector<10x1xf32>
    %cst_12 = arith.constant 3.200000e+01 : f32
    %18 = vector.broadcast %cst_12 : f32 to vector<10x1xf32>
    %19 = arith.divf %17, %18 : vector<10x1xf32>
    %20 = vector.broadcast %19 : vector<10x1xf32> to vector<10x32xf32>
    %21 = arith.subf %15, %20 : vector<10x32xf32>
    %22 = arith.mulf %21, %21 : vector<10x32xf32>
    %cst_13 = arith.constant dense<0.000000e+00> : vector<10xf32>
    %23 = vector.multi_reduction <add>, %22, %cst_13 [1] : vector<10x32xf32> to vector<10xf32>
    %24 = vector.shape_cast %23 : vector<10xf32> to vector<10x1xf32>
    %cst_14 = arith.constant 3.200000e+01 : f32
    %25 = vector.broadcast %cst_14 : f32 to vector<10x1xf32>
    %26 = arith.divf %24, %25 : vector<10x1xf32>
    %27 = vector.broadcast %19 : vector<10x1xf32> to vector<10x32xf32>
    %28 = arith.subf %15, %27 : vector<10x32xf32>
    %cst_15 = arith.constant 9.99999974E-6 : f32
    %29 = vector.broadcast %cst_15 : f32 to vector<10x1xf32>
    %30 = arith.addf %26, %29 : vector<10x1xf32>
    %31 = math.rsqrt %30 : vector<10x1xf32>
    %32 = vector.broadcast %31 : vector<10x1xf32> to vector<10x32xf32>
    %33 = arith.mulf %28, %32 : vector<10x32xf32>
    %c0_16 = arith.constant 0 : index
    %c0_17 = arith.constant 0 : index
    %34 = vector.load %arg6[%c0_16, %c0_17] : memref<1x32xf32, #tpu.memory_space<vmem>>, vector<1x32xf32>
    %35 = vector.broadcast %34 : vector<1x32xf32> to vector<10x32xf32>
    %36 = arith.mulf %33, %35 : vector<10x32xf32>
    %c0_18 = arith.constant 0 : index
    %c0_19 = arith.constant 0 : index
    %37 = vector.load %arg7[%c0_18, %c0_19] : memref<1x32xf32, #tpu.memory_space<vmem>>, vector<1x32xf32>
    %38 = vector.broadcast %37 : vector<1x32xf32> to vector<10x32xf32>
    %39 = arith.addf %36, %38 : vector<10x32xf32>
    %c0_20 = arith.constant 0 : index
    %c0_21 = arith.constant 0 : index
    %40 = vector.load %arg8[%c0_20, %c0_21] : memref<10x32xf32, #tpu.memory_space<vmem>>, vector<10x32xf32>
    tpu.vector_store %arg8[%c0_20, %c0_21], %39 {strides = array<i32>} : memref<10x32xf32, #tpu.memory_space<vmem>>, vector<10x32xf32>,
    return
  }
  func.func @transform_0(%arg0: i32) -> (i32, i32) {
    %c0_i32 = arith.constant 0 : i32
    %c0_i32_0 = arith.constant 0 : i32
    return %arg0, %c0_i32 : i32, i32
  }
  func.func @transform_1(%arg0: i32) -> (i32, i32) {
    %c0_i32 = arith.constant 0 : i32
    %c0_i32_0 = arith.constant 0 : i32
    %c0_i32_1 = arith.constant 0 : i32
    return %c0_i32, %c0_i32_0 : i32, i32
  }
  func.func @transform_2(%arg0: i32) -> (i32, i32) {
    %c0_i32 = arith.constant 0 : i32
    %c0_i32_0 = arith.constant 0 : i32
    %c0_i32_1 = arith.constant 0 : i32
    return %c0_i32, %c0_i32_0 : i32, i32
  }
  func.func @transform_3(%arg0: i32) -> (i32, i32) {
    %c0_i32 = arith.constant 0 : i32
    %c0_i32_0 = arith.constant 0 : i32
    %c0_i32_1 = arith.constant 0 : i32
    return %c0_i32, %c0_i32_0 : i32, i32
  }
  func.func @transform_4(%arg0: i32) -> (i32, i32) {
    %c0_i32 = arith.constant 0 : i32
    %c0_i32_0 = arith.constant 0 : i32
    %c0_i32_1 = arith.constant 0 : i32
    return %c0_i32, %c0_i32_0 : i32, i32
  }
  func.func @transform_5(%arg0: i32) -> (i32, i32) {
    %c0_i32 = arith.constant 0 : i32
    %c0_i32_0 = arith.constant 0 : i32
    %c0_i32_1 = arith.constant 0 : i32
    return %c0_i32, %c0_i32_0 : i32, i32
  }
  func.func @transform_6(%arg0: i32) -> (i32, i32) {
    %c0_i32 = arith.constant 0 : i32
    %c0_i32_0 = arith.constant 0 : i32
    %c0_i32_1 = arith.constant 0 : i32
    return %c0_i32, %c0_i32_0 : i32, i32
  }
  func.func @transform_7(%arg0: i32) -> (i32, i32) {
    %c0_i32 = arith.constant 0 : i32
    %c0_i32_0 = arith.constant 0 : i32
    return %arg0, %c0_i32 : i32, i32
  }
}

</mosaic_0001>

<bundles_post_ra>
// kernel: vit_forward.9
= control target key start
LH: loop header
LB: loop body
LE: loop exit
PB: predicated region body
PF: predicated region fallthrough
CT: control target
= control target key end

     0   :  { %vm194_vm0 = vcmask 261120   ;;  %s335_s1 = inlined_call_operand.vmem [shape: bf16[256,32], index: 1, kind: input, shape index: {}]   ;;  %s336_s0 = inlined_call_operand.vmem [shape: f32[8,256], index: 0, kind: input, shape index: {}]   ;;  %s337_s2 = inlined_call_operand.vmem [shape: f32[1,32], index: 2, kind: input, shape index: {}]   ;;  %s338_s3 = inlined_call_operand.vmem [shape: f32[8,32], index: 3, kind: output, shape index: {}]  }
   0x1   :  { %v239_v0 = vld [vmem:[%s335_s1 + $0x78] sm:$0xff]   ;;  %v241_v2 = vld [vmem:[%s335_s1 + $0x70] sm:$0xff]   ;;  %v243_v4 = vld [vmem:[%s335_s1 + $0x68] sm:$0xff]  }
   0x2   :  { %v240_v1 = vld [vmem:[%s335_s1 + $0x38] sm:$0xff]   ;;  %217 = vmatprep.subr.bf16.mxu0 %v239_v0  ;;  %v242_v3 = vld [vmem:[%s335_s1 + $0x30] sm:$0xff]   ;;  %v244_v5 = vld [vmem:[%s335_s1 + $0x28] sm:$0xff]  }
   0x3   :  { %218 = vmatpush3.bf16.msra.mxu0 %v240_v1  ;;  %v245_v6 = vld [vmem:[%s335_s1 + $0x60] sm:$0xff]   ;;  %v247_v8 = vld [vmem:[%s335_s1 + $0x58] sm:$0xff]   ;;  %v249_v10 = vld [vmem:[%s335_s1 + $0x50] sm:$0xff]  }
   0x4   :  { %219 = vmatprep.subr.bf16.mxu0 %v241_v2  ;;  %v246_v7 = vld [vmem:[%s335_s1 + $0x20] sm:$0xff]   ;;  %v248_v9 = vld [vmem:[%s335_s1 + $0x18] sm:$0xff]   ;;  %v16_v11 = vld [vmem:[%s336_s0 + $0x8] sm:$0xff] }
   0x5   :  { %v18_v12 = vpack.c.bf16 %v16_v11, %v16_v11  ;;  %v250_v13 = vld [vmem:[%s335_s1 + $0x10] sm:$0xff]   ;;  %v251_v14 = vld [vmem:[%s335_s1 + $0x48] sm:$0xff]   ;;  %v253_v16 = vld [vmem:[%s335_s1 + $0x40] sm:$0xff]  }
   0x6   :  { %v252_v15 = vld [vmem:[%s335_s1 + $0x8] sm:$0xff]   ;;  %v254_v17 = vld [vmem:[%s335_s1] sm:$0xff]  }
   0x7   :  { %220 = vmatpush3.bf16.msra.mxu0 %v242_v3  ;;  %186 = vmatprep.mubr.bf16.mxu0 %v18_v12  ;;  %v15_v18 = vld [vmem:[%s336_s0] sm:$0xff] }
   0x8   :  { %221 = vmatprep.subr.bf16.mxu0 %v243_v4  ;;  %v17_v19 = vpack.c.bf16 %v15_v18, %v15_v18  ;;  %v200_v21 = vld [vmem:[%s337_s2] ss:$0 sm:$0xff] }
   0xb   :  { %222 = vmatpush3.bf16.msra.mxu0 %v244_v5 }
   0xc   :  { %223 = vmatprep.subr.bf16.mxu0 %v245_v6 }
   0xf   :  { %224 = vmatpush3.bf16.msra.mxu0 %v246_v7 }
  0x10   :  { %225 = vmatprep.subr.bf16.mxu0 %v247_v8 }
  0x13   :  { %226 = vmatpush3.bf16.msra.mxu0 %v248_v9 }
  0x14   :  { %227 = vmatprep.subr.bf16.mxu0 %v249_v10 }
  0x17   :  { %228 = vmatpush3.bf16.msra.mxu0 %v250_v13 }
  0x18   :  { %229 = vmatprep.subr.bf16.mxu0 %v251_v14 }
  0x1b   :  { %230 = vmatpush3.bf16.msra.mxu0 %v252_v15 }
  0x1c   :  { %231 = vmatprep.subr.bf16.mxu0 %v253_v16 }
  0x1f   :  { %232 = vmatpush3.bf16.msra.mxu0 %v254_v17 }
  0x22   :  { %187 = vmatmul.mubr.bf16.vlgmr.msra.gmra.mxu0 %v17_v19 }
  0xe2   :  { %v233_v20 = vpop.f32.mrf.mxu0 }
  0xe4   :  { %v234_v22 = vpop.f32.mrf.mxu0 }
  0xe5   :  { %v235_v23 = vadd.f32 %v234_v22, %v233_v20 }
  0xe6   :  { %v236_v24 = vpop.f32.mrf.mxu0 }
  0xe7   :  { %v189_v25 = vadd.f32 %v235_v23, %v200_v21 }
  0xe8   :  { %v237_v26 = vpop.f32.mrf.mxu0 }
  0xe9   :  { %195 = vst.msk [vmem:[%s338_s3] sm:$0xff] %vm194_vm0, %v189_v25 }

// kernel: vit_forward.11
= control target key start
LH: loop header
LB: loop body
LE: loop exit
PB: predicated region body
PF: predicated region fallthrough
CT: control target
= control target key end

     0   :  { %s755_s15 = smov 0   ;;  %s757_s16 = smov 0   ;;  %s828_s0 = inlined_call_operand.vmem [shape: bf16[2,4,5,8], index: 0, kind: input, shape index: {}]   ;;  %s829_s1 = inlined_call_operand.vmem [shape: bf16[2,4,5,8], index: 1, kind: input, shape index: {}]   ;;  %s830_s2 = inlined_call_operand.vmem [shape: bf16[2,4,5,8], index: 2, kind: input, shape index: {}]   ;;  %s831_s3 = inlined_call_operand.vmem [shape: bf16[2,4,5,8], index: 3, kind: output, shape index: {0}]   ;;  %s832_s4 = inlined_call_operand.vmem [shape: f32[2,4,5,5], index: 4, kind: output, shape index: {1}]  }
   0x1   :  { %s759_s17 = smov 0   ;;  %s761_s18 = smov 0  }
   0x2   :  { %s763_s19 = smov 0  }
   0x3 LB: > { %s24_s20 = sadd.s32 1, %s717_s17  ;;  %s27_s21 = sadd.s32 1, %s721_s18  ;;  %s725_s19 = sphi %s763_s19, %s15_s19   ;;  %s721_s18 = sphi %s761_s18, %s836_s18   ;;  %s717_s17 = sphi %s759_s17, %s835_s17   ;;  %s713_s16 = sphi %s757_s16, %s834_s16   ;;  %s709_s15 = sphi %s755_s15, %s833_s15  }
   0x4   : > { %p25_p0 = scmp.ge.s32.totalorder %s24_s20, 4  ;;  %p609_p1 = scmp.ge.s32.totalorder %s725_s19, 1 }
   0x5   : > { %p216_p2 = scmp.lt.s32.totalorder %s725_s19, 9 }
   0x6   : > { %s838_s20 = smov (%p25_p0, %s24_s20), 0  ;;  %s840_s21 = smov (!%p25_p0, %s27_s21), %s721_s18 }
   0x7   : > { %p217_p3 = pnand %p609_p1, %p216_p2  ;;  %p29_p4 = scmp.ge.s32.totalorder %s840_s21, 2 }
   0x8   : > { %p272_p5 = scmp.lt.s32.totalorder (!%p217_p3), %s713_s16, 1  ;;  %p274_p6 = scmp.lt.s32.totalorder (!%p217_p3), %s709_s15, 3 }
   0x9   : > { %s842_s21 = smov (%p29_p4, %s840_s21), 0  ;;  %220 = sbr.rel (%p217_p3) target bundleno = 736 (0x2e0), region = 32 }
   0xe   : > { %v727_v0 = vmov 0.0   ;;  %vm728_vm0 = vmmov 0   ;;  %s844_s16 = smov (!%p272_p5, %s713_s16), 1  ;;  %s846_s15 = smov (!%p274_p6, %s709_s15), 3  ;;  %vm316_vm1 = vcmask 64512   ;;  %vm364_vm2 = vcmask 36864  }
   0xf   : > { %628 = vmatprep.subr.bf16.mxu0 %v727_v0  ;;  %630 = vmatprep.mubr.msk.bf16.mxu0 %vm728_vm0, %v727_v0  ;;  %s610_s22 = sshll.u32 %s844_s16, 2  ;;  %vm382_vm3 = vcmask 1041408   ;;  %vm383_vm4 = vcmask 1042432   ;;  %v729_v16 = vmov 65535   ;;  %vm378_vm5 = vcmask 39936  }
  0x10   : > { %634 = vmatprep.subr.bf16.mxu1 %v727_v0  ;;  %636 = vmatprep.mubr.msk.bf16.mxu1 %vm728_vm0, %v727_v0  ;;  %s785_s23 = sadd.s32 %s610_s22, %s846_s15  ;;  %v384_v17 = vsel %vm382_vm3, 4294967295, %v729_v16  ;;  %vm430_vm6 = vcmask 59392   ;;  %vm431_vm7 = vsmask.f32 2304 }
  0x11   : > { %s788_s24 = sshll.u32 %s785_s23, 2  ;;  %v385_v18 = vsel %vm383_vm4, %v384_v17, 0  ;;  %s619_s8 = sshll.u32 %s785_s23, 3  ;;  %vm432_vm8 = vmand %vm430_vm6, %vm431_vm7 }
  0x12   : > { %s287_s27 = scalar_lea.vmem %s829_s1, %s788_s24  ;;  %s279_s30 = scalar_lea.vmem %s828_s0, %s788_s24 }
  0x13   : > { %v314_v1 = vld [vmem:[%s287_s27] sm:$0x7]  ;;  %s295_s7 = scalar_lea.vmem %s830_s2, %s788_s24  ;;  %s311_s11 = scalar_lea.vmem %s832_s4, %s619_s8 }
  0x14   : > { %v321_v2 = vsel %vm316_vm1, %v314_v1, 0  ;;  %v313_v3 = vld [vmem:[%s279_s30] sm:$0x7]  ;;  %s303_s14 = scalar_lea.vmem %s831_s3, %s788_s24 }
  0x15   : > { %629 = vmatpush3.bf16.xpose.msra.mxu0 %v321_v2  ;;  %v315_v15 = vld [vmem:[%s295_s7] sm:$0x7] }
  0x16   : > { %v387_v19 = vand.u32 %v385_v18, %v315_v15  ;;  %v433_v25 = vld [vmem:[%s303_s14] sm:$0x7] }
  0x18   : > { %635 = vmatpush3.bf16.msra.mxu1 %v387_v19 }
  0x1c   : > { %631 = vmatmul.mubr.msk.bf16.vlgmr.msra.gmra.mxu0 %vm316_vm1, %v313_v3 }
  0xdc   : > { %v357_v4 = vpop.f32.mrf.mxu0 }
  0xdd   : > { %v363_v5 = vmul.f32 0.35355338, %v357_v4 }
  0xde   : > { %v632_v6 = vpop.f32.mrf.mxu0 }
  0xdf   : > { %v365_v7 = vsel %vm364_vm2, %v363_v5, -inf }
  0xe0   : > { %366 = vmax.xlane.f32.xlu0 %v365_v7  ;;  %v360_v8 = vpop.f32.mrf.mxu0 }
  0xe2   : > { %v633_v9 = vpop.f32.mrf.mxu0 }
 0x169   : > { %v367_v10 = vpop.xlane.xlu0 %366 }
 0x16a   : > { %v368_v11 = vsub.f32 %v363_v5, %v367_v10 }
 0x16c   : > { %v369_v12 = vmul.f32 1.442695, %v368_v11 }
 0x16e   : > { %683 = vpow2.f32 %v369_v12 }
 0x17b   : > { %v684_v13 = vpop.eup %683 }
 0x17c   : > { %v371_v14 = vsel %vm364_vm2, %v684_v13, 0.0 }
 0x17d   : > { %372 = vadd.xlane.f32.xlu0 %v371_v14 }
 0x206   : > { %v373_v20 = vpop.xlane.xlu0 %372 }
 0x207   : > { %685 = vrcp.f32 %v373_v20 }
 0x214   : > { %v686_v21 = vpop.eup %685 }
 0x215   : > { %v375_v22 = vmul.f32 %v686_v21, %v684_v13 }
 0x217   : > { %376 = vst.msk [vmem:[%s311_s11] sm:$0x1f] %vm364_vm2, %v375_v22  ;;  %v377_v23 = vpack.c.bf16 %v375_v22, %v375_v22 }
 0x219   : > { %637 = vmatmul.mubr.msk.bf16.vlgmr.msra.gmra.mxu1 %vm378_vm5, %v377_v23 }
 0x2d9   : > { %v423_v24 = vpop.f32.mrf.mxu1 }
 0x2da   : > { %v429_v26 = vpack.c.bf16 %v423_v24, %v423_v24 }
 0x2db   : > { %v638_v27 = vpop.f32.mrf.mxu1 }
 0x2dc   : > { %v434_v28 = vsel %vm432_vm8, %v429_v26, %v433_v25 }
 0x2dd   : > { %435 = vst [vmem:[%s303_s14] sm:$0x7] %v434_v28  ;;  %v426_v29 = vpop.f32.mrf.mxu1 }
 0x2df   : > { %v639_v30 = vpop.f32.mrf.mxu1 }
 0x2e0 PF: > { %s15_s19 = sadd.s32 1, %s725_s19   ;;  %s833_s15 = smov %s717_s17 }
 0x2e1   : > { %p12_p7 = scmp.ge.s32.totalorder %s15_s19, 10   ;;  %s834_s16 = smov %s721_s18 }
 0x2e2   : > { %s835_s17 = smov %s838_s20  ;;  %s836_s18 = smov %s842_s21 }
 0x2e3   :  { %14 = sbr.rel (!%p12_p7) target bundleno = 3 (0x3), region = 80 }

// kernel: vit_forward.10
= control target key start
LH: loop header
LB: loop body
LE: loop exit
PB: predicated region body
PF: predicated region fallthrough
CT: control target
= control target key end

     0   :  { %s849_s21 = smov 0   ;;  %s851_s22 = smov 0   ;;  %s963_s0 = inlined_call_operand.vmem [shape: f32[2,5,32], index: 0, kind: input, shape index: {}]   ;;  %s964_s1 = inlined_call_operand.vmem [shape: f32[5,32], index: 1, kind: input, shape index: {}]   ;;  %s965_s2 = inlined_call_operand.vmem [shape: bf16[32,96], index: 2, kind: input, shape index: {}]   ;;  %s966_s3 = inlined_call_operand.vmem [shape: f32[1,96], index: 3, kind: input, shape index: {}]   ;;  %s967_s4 = inlined_call_operand.vmem [shape: bf16[2,4,5,8], index: 4, kind: output, shape index: {0}]   ;;  %s968_s5 = inlined_call_operand.vmem [shape: bf16[2,4,5,8], index: 5, kind: output, shape index: {1}]   ;;  %s969_s6 = inlined_call_operand.vmem [shape: bf16[2,4,5,8], index: 6, kind: output, shape index: {2}]  }
   0x1   :  { %s853_s23 = smov 0  }
   0x2 LB: > { %s29_s24 = sadd.s32 1, %s795_s22  ;;  %p690_p0 = scmp.ge.s32.totalorder %s799_s23, 1  ;;  %s799_s23 = sphi %s853_s23, %s17_s23   ;;  %s795_s22 = sphi %s851_s22, %s973_s22   ;;  %s791_s21 = sphi %s849_s21, %s972_s21  }
   0x3   : > { %p31_p1 = scmp.ge.s32.totalorder %s29_s24, 2  ;;  %p248_p2 = scmp.lt.s32.totalorder %s799_s23, 3 }
   0x5   : > { %s975_s24 = smov (%p31_p1, %s29_s24), 0  ;;  %p249_p3 = pnand %p690_p0, %p248_p2 }
   0x6   : > { %p303_p4 = scmp.lt.s32.totalorder (!%p249_p3), %s791_s21, 1  ;;  %s803_s17 = smov (!%p249_p3), 120  }
   0x7   : > { %252 = sbr.rel (%p249_p3) target bundleno = 355 (0x163), region = 36  ;;  %s804_s18 = smov (!%p249_p3), 96  }
   0x8   : > { %s805_s19 = smov (!%p249_p3), 88   ;;  %s806_s20 = smov (!%p249_p3), 64  }
   0x9   : > { %s808_s25 = smov (!%p249_p3), 56   ;;  %s809_s26 = smov (!%p249_p3), 48  }
   0xa   : > { %s810_s27 = smov (!%p249_p3), 80   ;;  %s811_s28 = smov (!%p249_p3), 72  }
   0xb   : > { %s813_s30 = smov (!%p249_p3), 40  }
   0xc   : > { %v775_v0 = vld [vmem:[%s965_s2 + $0x8] sm:$0xff]   ;;  %v801_v1 = vmov 0.0   ;;  %v776_v2 = vld [vmem:[%s965_s2] sm:$0xff]   ;;  %vm802_vm0 = vmmov 0   ;;  %s977_s21 = smov (!%p303_p4, %s791_s21), 1  ;;  %vm366_vm1 = vcmask 261120  }
   0xd   : > { %730 = vmatprep.subr.bf16.mxu0 %v801_v1  ;;  %734 = vmatprep.mubr.msk.bf16.mxu0 %vm802_vm0, %v801_v1  ;;  %s691_s29 = sshll.u32 %s977_s21, 3  ;;  %v340_v3 = vld [vmem:[%s964_s1] sm:$0x1f]  ;;  %s879_s11 = sshll.u32 %s977_s21, 4  ;;  %vm411_vm2 = vcmask 59392  }
   0xe   : > { %731 = vmatpush3.bf16.msra.mxu0 %v775_v0  ;;  %s309_s10 = scalar_lea.vmem %s963_s0, %s691_s29  ;;  %v698_v7 = vld [vmem:[%s966_s3] ss:$0 sm:$0xff]  ;;  %s888_s16 = scalar_lea.vmem %s967_s4, %s879_s11  ;;  %vm412_vm3 = vsmask.f32 2304 }
   0xf   : > { %732 = vmatprep.subr.bf16.mxu0 %v801_v1  ;;  %v339_v4 = vld [vmem:[%s309_s10] sm:$0x1f]  ;;  %vm891_vm4 = vmand %vm411_vm2, %vm412_vm3  ;;  %s807_s21 = smov 112   ;;  %s812_s29 = smov 104   ;;  %v709_v29 = vld [vmem:[%s888_s16 + $0x8] sm:$0x7] }
  0x10   : > { %v341_v5 = vadd.f32 %v340_v3, %v339_v4  ;;  %v414_v10 = vld [vmem:[%s888_s16] sm:$0x7]  ;;  %s902_s9 = scalar_lea.vmem %s968_s5, %s879_s11  ;;  %v703_v17 = vld [vmem:[%s888_s16 + $0x4] sm:$0x7]  ;;  %s910_s13 = scalar_lea.vmem %s969_s6, %s879_s11  ;;  %v715_v42 = vld [vmem:[%s888_s16 + $0xc] sm:$0x7] }
  0x11   : > { %v423_v18 = vld [vmem:[%s902_s9] sm:$0x7]  ;;  %v705_v23 = vld [vmem:[%s902_s9 + $0x4] sm:$0x7]  ;;  %v713_v35 = vld [vmem:[%s910_s13 + $0x8] sm:$0x7] }
  0x12   : > { %733 = vmatpush3.bf16.msra.mxu0 %v776_v2  ;;  %v342_v6 = vpack.c.bf16 %v341_v5, %v341_v5  ;;  %v429_v24 = vld [vmem:[%s910_s13] sm:$0x7]  ;;  %v707_v30 = vld [vmem:[%s910_s13 + $0x4] sm:$0x7]  ;;  %v711_v36 = vld [vmem:[%s902_s9 + $0x8] sm:$0x7] }
  0x13   : > { %v717_v41 = vld [vmem:[%s902_s9 + $0xc] sm:$0x7] }
  0x14   : > { %v719_v47 = vld [vmem:[%s910_s13 + $0xc] sm:$0x7] }
  0x15   : > { %735 = vmatmul.mubr.msk.bf16.vlgmr.msra.gmra.mxu0 %vm366_vm1, %v342_v6 }
  0xd5   : > { %v404_v8 = vpop.f32.mrf.mxu0 }
  0xd6   : > { %v405_v9 = vadd.f32 %v698_v7, %v404_v8 }
  0xd7   : > { %v736_v11 = vpop.f32.mrf.mxu0 }
  0xd8   : > { %v410_v13 = vpack.c.bf16 %v405_v9, %v405_v9 }
  0xd9   : > { %v407_v14 = vpop.f32.mrf.mxu0 }
  0xda   : > { %432 = vrot.lane.b32.xlu1 %v410_v13, %s803_s17  ;;  %420 = vrot.lane.b32.xlu0 %v410_v13, %s804_s18  ;;  %v415_v15 = vsel %vm891_vm4, %v410_v13, %v414_v10 }
  0xdb   : > { %v737_v16 = vpop.f32.mrf.mxu0  ;;  %416 = vst [vmem:[%s888_s16] sm:$0x7] %v415_v15 }
  0xde   : > { %439 = vrot.lane.b32.xlu1 %v410_v13, %s805_s19  ;;  %426 = vrot.lane.b32.xlu0 %v410_v13, %s806_s20 }
  0xe2   : > { %453 = vrot.lane.b32.xlu1 %v410_v13, %s807_s21  ;;  %446 = vrot.lane.b32.xlu0 %v410_v13, %s808_s25 }
  0xe6   : > { %467 = vrot.lane.b32.xlu1 %v410_v13, %s809_s26  ;;  %460 = vrot.lane.b32.xlu0 %v410_v13, %s810_s27 }
  0xea   : > { %481 = vrot.lane.b32.xlu1 %v410_v13, %s811_s28  ;;  %474 = vrot.lane.b32.xlu0 %v410_v13, %s812_s29 }
  0xee   : > { %488 = vrot.lane.b32.xlu0 %v410_v13, %s813_s30 }
 0x14c   : > { %v433_v19 = vpop.permute.xlu1 %432  ;;  %v421_v20 = vpop.permute.xlu0 %420 }
 0x14d   : > { %v437_v21 = vsel %vm891_vm4, %v433_v19, %v703_v17  ;;  %v424_v22 = vsel %vm891_vm4, %v421_v20, %v423_v18 }
 0x14e   : > { %704 = vst [vmem:[%s888_s16 + $0x4] sm:$0x7] %v437_v21  ;;  %425 = vst [vmem:[%s902_s9] sm:$0x7] %v424_v22 }
 0x150   : > { %v440_v25 = vpop.permute.xlu1 %439  ;;  %v427_v26 = vpop.permute.xlu0 %426 }
 0x151   : > { %v444_v27 = vsel %vm891_vm4, %v440_v25, %v705_v23  ;;  %v430_v28 = vsel %vm891_vm4, %v427_v26, %v429_v24 }
 0x152   : > { %706 = vst [vmem:[%s902_s9 + $0x4] sm:$0x7] %v444_v27  ;;  %431 = vst [vmem:[%s910_s13] sm:$0x7] %v430_v28 }
 0x154   : > { %v454_v31 = vpop.permute.xlu1 %453  ;;  %v447_v32 = vpop.permute.xlu0 %446 }
 0x155   : > { %v458_v33 = vsel %vm891_vm4, %v454_v31, %v709_v29  ;;  %v451_v34 = vsel %vm891_vm4, %v447_v32, %v707_v30 }
 0x156   : > { %710 = vst [vmem:[%s888_s16 + $0x8] sm:$0x7] %v458_v33  ;;  %708 = vst [vmem:[%s910_s13 + $0x4] sm:$0x7] %v451_v34 }
 0x158   : > { %v468_v37 = vpop.permute.xlu1 %467  ;;  %v461_v38 = vpop.permute.xlu0 %460 }
 0x159   : > { %v472_v39 = vsel %vm891_vm4, %v468_v37, %v713_v35  ;;  %v465_v40 = vsel %vm891_vm4, %v461_v38, %v711_v36 }
 0x15a   : > { %714 = vst [vmem:[%s910_s13 + $0x8] sm:$0x7] %v472_v39  ;;  %712 = vst [vmem:[%s902_s9 + $0x8] sm:$0x7] %v465_v40 }
 0x15c   : > { %v482_v43 = vpop.permute.xlu1 %481  ;;  %v475_v44 = vpop.permute.xlu0 %474 }
 0x15d   : > { %v486_v45 = vsel %vm891_vm4, %v482_v43, %v717_v41  ;;  %v479_v46 = vsel %vm891_vm4, %v475_v44, %v715_v42 }
 0x15e   : > { %718 = vst [vmem:[%s902_s9 + $0xc] sm:$0x7] %v486_v45  ;;  %716 = vst [vmem:[%s888_s16 + $0xc] sm:$0x7] %v479_v46 }
 0x160   : > { %v489_v48 = vpop.permute.xlu0 %488 }
 0x161   : > { %v493_v49 = vsel %vm891_vm4, %v489_v48, %v719_v47 }
 0x162   : > { %720 = vst [vmem:[%s910_s13 + $0xc] sm:$0x7] %v493_v49 }
 0x163 PF: > { %s17_s23 = sadd.s32 1, %s799_s23   ;;  %s972_s21 = smov %s795_s22 }
 0x164   : > { %p14_p5 = scmp.ge.s32.totalorder %s17_s23, 4   ;;  %s973_s22 = smov %s975_s24 }
 0x166   :  { %16 = sbr.rel (!%p14_p5) target bundleno = 2 (0x2), region = 102 }

// kernel: vit_forward.12
= control target key start
LH: loop header
LB: loop body
LE: loop exit
PB: predicated region body
PF: predicated region fallthrough
CT: control target
= control target key end

     0   :  { %s861_s24 = smov 0   ;;  %s863_s25 = smov 0   ;;  %s940_s0 = inlined_call_operand.vmem [shape: bf16[2,4,5,8], index: 0, kind: input, shape index: {}]   ;;  %s941_s1 = inlined_call_operand.vmem [shape: f32[2,5,32], index: 1, kind: input, shape index: {}]   ;;  %s942_s2 = inlined_call_operand.vmem [shape: f32[5,32], index: 2, kind: input, shape index: {}]   ;;  %s943_s3 = inlined_call_operand.vmem [shape: bf16[4,8,32], index: 3, kind: input, shape index: {}]   ;;  %s944_s4 = inlined_call_operand.vmem [shape: f32[1,32], index: 4, kind: input, shape index: {}]   ;;  %s945_s5 = inlined_call_operand.vmem [shape: f32[1,32], index: 5, kind: input, shape index: {}]   ;;  %s946_s6 = inlined_call_operand.vmem [shape: f32[1,32], index: 6, kind: input, shape index: {}]   ;;  %s947_s7 = inlined_call_operand.vmem [shape: f32[2,5,32], index: 7, kind: output, shape index: {}]  }
   0x1   :  { %s865_s26 = smov 0  }
   0x2 LB: > { %s29_s27 = sadd.s32 1, %s813_s25  ;;  %p714_p0 = scmp.ge.s32.totalorder %s817_s26, 1  ;;  %s817_s26 = sphi %s865_s26, %s17_s26   ;;  %s813_s25 = sphi %s863_s25, %s949_s25   ;;  %s809_s24 = sphi %s861_s24, %s948_s24  }
   0x3   : > { %p31_p1 = scmp.ge.s32.totalorder %s29_s27, 2  ;;  %p279_p2 = scmp.lt.s32.totalorder %s817_s26, 3 }
   0x5   : > { %s951_s27 = smov (%p31_p1, %s29_s27), 0  ;;  %p280_p3 = pnand %p714_p0, %p279_p2 }
   0x6   : > { %p327_p4 = scmp.lt.s32.totalorder (!%p280_p3), %s809_s24, 1 }
   0x7   : > { %283 = sbr.rel (%p280_p3) target bundleno = 531 (0x213), region = 48 }
   0xc   : > { %v366_v0 = vld [vmem:[%s943_s3] sm:$0xf]  ;;  %vm371_vm0 = vcmask 1043456   ;;  %v722_v1 = vld [vmem:[%s943_s3 + $0x4] sm:$0xf]  ;;  %v819_v2 = vmov 0.0  }
   0xd   : > { %743 = vmatprep.subr.bf16.mxu0 %v819_v2  ;;  %v373_v3 = vsel %vm371_vm0, %v366_v0, 0  ;;  %749 = vmatprep.subr.bf16.mxu1 %v819_v2  ;;  %v424_v4 = vsel %vm371_vm0, %v722_v1, 0  ;;  %vm820_vm1 = vmmov 0   ;;  %s953_s24 = smov (!%p327_p4, %s809_s24), 1  ;;  %v725_v5 = vld [vmem:[%s943_s3 + $0x8] sm:$0xf] }
   0xe   : > { %744 = vmatpush3.bf16.msra.mxu0 %v373_v3  ;;  %750 = vmatpush3.bf16.msra.mxu1 %v424_v4  ;;  %v728_v6 = vld [vmem:[%s943_s3 + $0xc] sm:$0xf]  ;;  %s734_s13 = sshll.u32 %s953_s24, 4  ;;  %vm367_vm2 = vcmask 64512   ;;  %v475_v7 = vsel %vm371_vm0, %v725_v5, 0  ;;  %s717_s17 = sshll.u32 %s953_s24, 3 }
   0xf   : > { %745 = vmatprep.mubr.msk.bf16.mxu0 %vm820_vm1, %v819_v2  ;;  %751 = vmatprep.mubr.msk.bf16.mxu1 %vm820_vm1, %v819_v2  ;;  %s334_s16 = scalar_lea.vmem %s940_s0, %s734_s13  ;;  %v526_v8 = vsel %vm371_vm0, %v728_v6, 0  ;;  %s341_s20 = scalar_lea.vmem %s941_s1, %s717_s17  ;;  %v355_v14 = vld [vmem:[%s942_s2] sm:$0x1f]  ;;  %vm569_vm3 = vcmask 258048  }
  0x10   : > { %755 = vmatprep.subr.bf16.mxu0 %v819_v2  ;;  %761 = vmatprep.subr.bf16.mxu1 %v819_v2  ;;  %v365_v9 = vld [vmem:[%s334_s16] sm:$0x7]  ;;  %v721_v10 = vld [vmem:[%s334_s16 + $0x4] sm:$0x7]  ;;  %v724_v11 = vld [vmem:[%s334_s16 + $0x8] sm:$0x7]  ;;  %s352_s12 = scalar_lea.vmem %s947_s7, %s717_s17 }
  0x11   : > { %746 = vmatmul.mubr.msk.bf16.vlgmr.msra.gmra.mxu0 %vm367_vm2, %v365_v9  ;;  %752 = vmatmul.mubr.msk.bf16.vlgmr.msra.gmra.mxu1 %vm367_vm2, %v721_v10  ;;  %v727_v12 = vld [vmem:[%s334_s16 + $0xc] sm:$0x7]  ;;  %v354_v13 = vld [vmem:[%s341_s20] sm:$0x1f] }
  0x12   : > { %756 = vmatpush3.bf16.msra.mxu0 %v475_v7  ;;  %762 = vmatpush3.bf16.msra.mxu1 %v526_v8  ;;  %v356_v15 = vadd.f32 %v355_v14, %v354_v13  ;;  %v719_v16 = vld [vmem:[%s944_s4] ss:$0 sm:$0xff] }
  0x13   : > { %757 = vmatprep.mubr.msk.bf16.mxu0 %vm820_vm1, %v819_v2  ;;  %763 = vmatprep.mubr.msk.bf16.mxu1 %vm820_vm1, %v819_v2  ;;  %v730_v48 = vld [vmem:[%s945_s5] ss:$0 sm:$0xff] }
  0x14   : > { %v364_v17 = vadd.f32 %v719_v16, %v356_v15  ;;  %v731_v50 = vld [vmem:[%s946_s6] ss:$0 sm:$0xff] }
  0x19   : > { %758 = vmatmul.mubr.msk.bf16.vlgmr.msra.gmra.mxu0 %vm367_vm2, %v724_v11  ;;  %764 = vmatmul.mubr.msk.bf16.vlgmr.msra.gmra.mxu1 %vm367_vm2, %v727_v12 }
  0xd1   : > { %v409_v18 = vpop.f32.mrf.mxu0  ;;  %v460_v19 = vpop.f32.mrf.mxu1 }
  0xd2   : > { %v415_v22 = vadd.f32 %v409_v18, %v364_v17 }
  0xd3   : > { %v747_v20 = vpop.f32.mrf.mxu0  ;;  %v753_v21 = vpop.f32.mrf.mxu1 }
  0xd4   : > { %v466_v27 = vadd.f32 %v460_v19, %v415_v22 }
  0xd5   : > { %v412_v23 = vpop.f32.mrf.mxu0  ;;  %v463_v24 = vpop.f32.mrf.mxu1 }
  0xd7   : > { %v748_v25 = vpop.f32.mrf.mxu0  ;;  %v754_v26 = vpop.f32.mrf.mxu1 }
  0xd9   : > { %v511_v28 = vpop.f32.mrf.mxu0  ;;  %v562_v29 = vpop.f32.mrf.mxu1 }
  0xda   : > { %v517_v30 = vadd.f32 %v511_v28, %v466_v27 }
  0xdb   : > { %v759_v31 = vpop.f32.mrf.mxu0  ;;  %v765_v32 = vpop.f32.mrf.mxu1 }
  0xdc   : > { %v568_v33 = vadd.f32 %v562_v29, %v517_v30 }
  0xdd   : > { %v514_v34 = vpop.f32.mrf.mxu0  ;;  %v565_v35 = vpop.f32.mrf.mxu1 }
  0xde   : > { %v570_v36 = vsel %vm569_vm3, %v568_v33, 0.0 }
  0xdf   : > { %v766_v37 = vpop.f32.mrf.mxu1  ;;  %571 = vadd.xlane.f32.xlu0 %v570_v36  ;;  %v760_v38 = vpop.f32.mrf.mxu0 }
 0x168   : > { %v572_v39 = vpop.xlane.xlu0 %571 }
 0x169   : > { %v574_v40 = vmul.f32 0.03125, %v572_v39 }
 0x16b   : > { %v575_v41 = vsub.f32 %v568_v33, %v574_v40 }
 0x16d   : > { %v576_v42 = vmul.f32 %v575_v41, %v575_v41 }
 0x16f   : > { %v577_v43 = vsel %vm569_vm3, %v576_v42, 0.0 }
 0x170   : > { %578 = vadd.xlane.f32.xlu0 %v577_v43 }
 0x1f9   : > { %v579_v44 = vpop.xlane.xlu0 %578 }
 0x1fa   : > { %v580_v45 = vmul.f32 0.03125, %v579_v44 }
 0x1fc   : > { %v581_v46 = vadd.f32 1e-05, %v580_v45 }
 0x1fe   : > { %793 = vrsqrt.f32 %v581_v46 }
 0x20b   : > { %v794_v47 = vpop.eup %793 }
 0x20c   : > { %v583_v49 = vmul.f32 %v794_v47, %v575_v41 }
 0x20e   : > { %v591_v51 = vmul.f32 %v730_v48, %v583_v49 }
 0x210   : > { %v599_v52 = vadd.f32 %v731_v50, %v591_v51 }
 0x212   : > { %600 = vst.msk [vmem:[%s352_s12] sm:$0x1f] %vm569_vm3, %v599_v52 }
 0x213 PF: > { %s17_s26 = sadd.s32 1, %s817_s26   ;;  %s948_s24 = smov %s813_s25 }
 0x214   : > { %p14_p5 = scmp.ge.s32.totalorder %s17_s26, 4   ;;  %s949_s25 = smov %s951_s27 }
 0x216   :  { %16 = sbr.rel (!%p14_p5) target bundleno = 2 (0x2), region = 90 }

// kernel: vit_forward.13
= control target key start
LH: loop header
LB: loop body
LE: loop exit
PB: predicated region body
PF: predicated region fallthrough
CT: control target
= control target key end

     0   :  { %v293_v0 = vmov 0.0   ;;  %vm294_vm0 = vmmov 0   ;;  %vm53_vm1 = vcmask 261120   ;;  %vm133_vm2 = vcmask 523264   ;;  %s384_s1 = inlined_call_operand.vmem [shape: bf16[32,64], index: 1, kind: input, shape index: {}]   ;;  %s385_s0 = inlined_call_operand.vmem [shape: f32[10,32], index: 0, kind: input, shape index: {}]   ;;  %s386_s3 = inlined_call_operand.vmem [shape: bf16[64,32], index: 3, kind: input, shape index: {}]   ;;  %s387_s2 = inlined_call_operand.vmem [shape: f32[1,64], index: 2, kind: input, shape index: {}]   ;;  %s388_s4 = inlined_call_operand.vmem [shape: f32[1,32], index: 4, kind: input, shape index: {}]   ;;  %s389_s5 = inlined_call_operand.vmem [shape: f32[1,32], index: 5, kind: input, shape index: {}]   ;;  %s390_s6 = inlined_call_operand.vmem [shape: f32[1,32], index: 6, kind: input, shape index: {}]   ;;  %s391_s7 = inlined_call_operand.vmem [shape: f32[10,32], index: 7, kind: output, shape index: {}]  }
   0x1   :  { %261 = vmatprep.subr.bf16.mxu0 %v293_v0  ;;  %v283_v1 = vld [vmem:[%s384_s1 + $0x8] sm:$0xff]   ;;  %265 = vmatprep.mubr.msk.bf16.mxu0 %vm294_vm0, %v293_v0  ;;  %v284_v2 = vld [vmem:[%s384_s1] sm:$0xff]   ;;  %v285_v5 = vld [vmem:[%s386_s3 + $0x18] sm:$0xff]   ;;  %vm192_vm3 = vcmask 254976  }
   0x2   :  { %269 = vmatprep.subr.bf16.mxu1 %v293_v0  ;;  %277 = vmatprep.mubr.msk.bf16.mxu1 %vm294_vm0, %v293_v0  ;;  %v27_v3 = vld [vmem:[%s385_s0] sm:$0xff]  ;;  %v28_v4 = vld [vmem:[%s385_s0 + $0x8] sm:$0x3]  ;;  %v286_v7 = vld [vmem:[%s386_s3 + $0x10] sm:$0xff]  }
   0x3   :  { %262 = vmatpush3.bf16.msra.mxu0 %v283_v1  ;;  %v29_v6 = vpack.c.bf16 %v28_v4, %v27_v3  ;;  %270 = vmatpush3.bf16.msra.mxu1 %v285_v5  ;;  %v287_v8 = vld [vmem:[%s386_s3 + $0x8] sm:$0xff]   ;;  %v288_v9 = vld [vmem:[%s386_s3] sm:$0xff]  }
   0x4   :  { %263 = vmatprep.subr.bf16.mxu0 %v293_v0  ;;  %271 = vmatprep.subr.bf16.mxu1 %v293_v0  ;;  %v241_v10 = vld [vmem:[%s387_s2] ss:$0 sm:$0xff] }
   0x5   :  { %v250_v21 = vld [vmem:[%s388_s4] ss:$0 sm:$0xff] }
   0x6   :  { %v251_v48 = vld [vmem:[%s389_s5] ss:$0 sm:$0xff] }
   0x7   :  { %264 = vmatpush3.bf16.msra.mxu0 %v284_v2  ;;  %272 = vmatpush3.bf16.msra.mxu1 %v286_v7  ;;  %v252_v50 = vld [vmem:[%s390_s6] ss:$0 sm:$0xff] }
   0x8   :  { %273 = vmatprep.subr.bf16.mxu1 %v293_v0 }
   0xa   :  { %266 = vmatmul.mubr.msk.bf16.vlgmr.msra.gmra.mxu0 %vm53_vm1, %v29_v6 }
   0xb   :  { %274 = vmatpush3.bf16.msra.mxu1 %v287_v8 }
   0xc   :  { %275 = vmatprep.subr.bf16.mxu1 %v293_v0 }
   0xf   :  { %276 = vmatpush3.bf16.msra.mxu1 %v288_v9 }
  0xca   :  { %v91_v11 = vpop.f32.mrf.mxu0 }
  0xcb   :  { %v92_v13 = vadd.f32 %v241_v10, %v91_v11 }
  0xcc   :  { %v267_v12 = vpop.f32.mrf.mxu0 }
  0xcd   :  { %v98_v17 = vmax.f32 %v92_v13, 0.0 }
  0xce   :  { %v94_v14 = vpop.f32.mrf.mxu0 }
  0xcf   :  { %v95_v15 = vadd.f32 %v241_v10, %v94_v14 }
  0xd0   :  { %v268_v16 = vpop.f32.mrf.mxu0 }
  0xd1   :  { %v99_v18 = vmax.f32 %v95_v15, 0.0 }
  0xd3   :  { %v100_v19 = vpack.c.bf16 %v99_v18, %v98_v17 }
  0xd5   :  { %278 = vmatmul.mubr.msk.bf16.vlgmr.msra.gmra.mxu1 %vm133_vm2, %v100_v19 }
 0x195   :  { %v171_v20 = vpop.f32.mrf.mxu1 }
 0x196   :  { %v178_v22 = vadd.f32 %v171_v20, %v27_v3 }
 0x197   :  { %v279_v23 = vpop.f32.mrf.mxu1 }
 0x198   :  { %v187_v24 = vadd.f32 %v250_v21, %v178_v22 }
 0x199   :  { %v174_v25 = vpop.f32.mrf.mxu1 }
 0x19a   :  { %v179_v26 = vadd.f32 %v174_v25, %v28_v4  ;;  %v189_v27 = vsel %vm53_vm1, %v187_v24, 0.0 }
 0x19b   :  { %190 = vadd.xlane.f32.xlu0 %v189_v27  ;;  %v280_v28 = vpop.f32.mrf.mxu1 }
 0x19c   :  { %v188_v29 = vadd.f32 %v250_v21, %v179_v26 }
 0x19e   :  { %v193_v30 = vsel %vm192_vm3, %v188_v29, 0.0 }
 0x19f   :  { %194 = vadd.xlane.f32.xlu0 %v193_v30 }
 0x224   :  { %v191_v31 = vpop.xlane.xlu0 %190 }
 0x225   :  { %v197_v32 = vmul.f32 0.03125, %v191_v31 }
 0x227   :  { %v199_v33 = vsub.f32 %v187_v24, %v197_v32 }
 0x228   :  { %v195_v34 = vpop.xlane.xlu0 %194 }
 0x229   :  { %v198_v35 = vmul.f32 0.03125, %v195_v34  ;;  %v201_v36 = vmul.f32 %v199_v33, %v199_v33 }
 0x22b   :  { %v200_v37 = vsub.f32 %v188_v29, %v198_v35  ;;  %v203_v38 = vsel %vm53_vm1, %v201_v36, 0.0 }
 0x22c   :  { %204 = vadd.xlane.f32.xlu1 %v203_v38 }
 0x22d   :  { %v202_v39 = vmul.f32 %v200_v37, %v200_v37 }
 0x22f   :  { %v206_v40 = vsel %vm192_vm3, %v202_v39, 0.0 }
 0x230   :  { %207 = vadd.xlane.f32.xlu1 %v206_v40 }
 0x2b5   :  { %v205_v41 = vpop.xlane.xlu1 %204 }
 0x2b6   :  { %v209_v42 = vmul.f32 0.03125, %v205_v41 }
 0x2b8   :  { %v211_v43 = vadd.f32 1e-05, %v209_v42 }
 0x2b9   :  { %v208_v44 = vpop.xlane.xlu1 %207 }
 0x2ba   :  { %289 = vrsqrt.f32 %v211_v43  ;;  %v210_v45 = vmul.f32 0.03125, %v208_v44 }
 0x2bc   :  { %v212_v46 = vadd.f32 1e-05, %v210_v45 }
 0x2be   :  { %291 = vrsqrt.f32 %v212_v46 }
 0x2c7   :  { %v290_v47 = vpop.eup %289 }
 0x2c8   :  { %v215_v49 = vmul.f32 %v290_v47, %v199_v33 }
 0x2ca   :  { %v224_v51 = vmul.f32 %v251_v48, %v215_v49 }
 0x2cb   :  { %v292_v52 = vpop.eup %291 }
 0x2cc   :  { %v233_v53 = vadd.f32 %v252_v50, %v224_v51  ;;  %v216_v54 = vmul.f32 %v292_v52, %v200_v37 }
 0x2ce   :  { %235 = vst.msk [vmem:[%s391_s7] sm:$0xff] %vm53_vm1, %v233_v53  ;;  %v225_v55 = vmul.f32 %v251_v48, %v216_v54 }
 0x2d0   :  { %v234_v56 = vadd.f32 %v252_v50, %v225_v55 }
 0x2d2   :  { %236 = vst.msk [vmem:[%s391_s7 + $0x8] sm:$0x3] %vm192_vm3, %v234_v56 }

</bundles_post_ra>
